<compile_context>
chip_gen: v7x
topology: tpu7x:2x2x1
jax: 0.10.0
libtpu: 0.0.40
codegen_flags: <defaults>
</compile_context>

<pallas_src>
import functools

import jax
import jax.numpy as jnp
import numpy as np
from jax import lax
from jax.experimental import pallas as pl
from jax.experimental.pallas import tpu as pltpu

P = 12  # pitch_vector_length == number of circular transpositions (roots)


def _round_up(x, m):
    return (x + m - 1) // m * m


def _mxu_lane_width():
    """128 for v2-v5 (128x128 MXUs), 256 for v6e / v7x (2x256x256)."""
    try:
        kind = jax.devices()[0].device_kind.lower()
    except Exception:
        return 256
    if any(v in kind for v in ("v2", "v3", "v4", "v5")):
        return 128
    return 256


def _make_groups(hidden_size, mxu_width):
    """Split the 12 roots into contiguous groups whose lane width
    (group*hidden_size) is (a) a multiple of 128 -> lane-aligned, free slices,
    and (b) <= the MXU tile width -> one (K,N) MXU pass per group per layer.
    Falls back to one dense group when hidden_size does not divide 128."""
    if 128 % hidden_size != 0:
        return (P,)
    rpb = 128 // hidden_size            # roots per 128-lane block
    if P % rpb != 0:
        return (P,)
    n_blocks = P // rpb
    blocks_per_group = max(1, mxu_width // 128)
    groups, rem = [], n_blocks
    while rem > 0:
        take = min(blocks_per_group, rem)
        groups.append(take * rpb)
        rem -= take
    return tuple(groups)


def _ti_cnn_kernel(x_ref, w0_ref, b0_ref, w1_ref, b1_ref, *rest,
                   groups, sizes, num_hidden, hidden_size):
    """One batch tile of the full forward pass (all 12 roots folded into lanes).

    x_ref  : (TB, 12)            f32 pitch vectors (cast to bf16 in-kernel)
    w0_ref : (12, 12*C)          bf16 folded circular-conv weight
    b0_ref : (1, 12*C)           f32
    w1_ref : (12*C, 12*H)        bf16 block-diagonal input Linear
    b1_ref : (1, 12*H)           f32
    rest   : [wh_s (L,s*H,s*H) bf16 per distinct group size s,
              bh (L, 12*H) f32,
              wo (12*H, 12*K) bf16 block-diagonal output Linear,
              bo (1, 12*K) f32,
              o_ref (TB, 12*K)]
    """
    H = hidden_size
    n = len(sizes)
    wh_refs = rest[:n]
    bh_ref = rest[n]
    wo_ref = rest[n + 1]
    bo_ref = rest[n + 2]
    o_ref = rest[n + 3]
    size_idx = {s: i for i, s in enumerate(sizes)}
    offs, acc = [], 0
    for g in groups:
        offs.append(acc)
        acc += g

    bf16 = jnp.bfloat16

    # Circular Conv1d (cross-correlation) for all 12 roots at once, then ReLU.
    # Input cast f32->bf16 in-kernel (VPU has slack); f32 accumulation on MXU.
    h = jnp.dot(x_ref[...].astype(bf16), w0_ref[...],
                preferred_element_type=jnp.float32)
    h = jnp.maximum(h + b0_ref[...], 0.0)

    # Input Linear + ReLU (dropout / batch_norm are eval-mode identities).
    # 12*C <= 128, so root-blocking buys nothing here; keep one dense dot.
    h = jnp.dot(h.astype(bf16), w1_ref[...], preferred_element_type=jnp.float32)
    h = jnp.maximum(h + b1_ref[...], 0.0)

    # Split into per-root-group slabs (static lane-aligned slices -> free).
    hg = [h[:, off * H:(off + g) * H] for off, g in zip(offs, groups)]

    def layer_step(layer, carry):
        # One MXU-width dot per root group; weights loaded once per layer.
        w_by_size = {s: wh_refs[i][layer] for i, s in enumerate(sizes)}
        new = []
        for gi, (off, g) in enumerate(zip(offs, groups)):
            b = bh_ref[pl.ds(layer, 1), off * H:(off + g) * H]
            a = jnp.dot(carry[gi].astype(bf16), w_by_size[g],
                        preferred_element_type=jnp.float32)
            new.append(jnp.maximum(a + b, 0.0))
        return new

    if num_hidden <= 8:
        for layer in range(num_hidden):     # static unroll: LLO sees the body
            hg = layer_step(layer, hg)
    else:
        # Very deep configs: fori_loop bounds live ranges / code size.
        def body(layer, carry):
            return tuple(layer_step(layer, list(carry)))
        hg = list(lax.fori_loop(0, num_hidden, body, tuple(hg)))

    # Output Linear as a K-split sum over the same root groups: each slab
    # contracts against its sublane-aligned row block of the block-diagonal
    # weight, so no lane concatenation is needed and the store stays a single
    # lane-dense (TB, 12*K) write.  MXU-optimal on v6e/v7x.
    out = None
    for gi, (off, g) in enumerate(zip(offs, groups)):
        w = wo_ref[off * H:(off + g) * H, :]
        t = jnp.dot(hg[gi].astype(bf16), w, preferred_element_type=jnp.float32)
        out = t if out is None else out + t

    # The module really does ReLU its logits.
    o_ref[...] = jnp.maximum(out + bo_ref[...], 0.0).astype(o_ref.dtype)


def fold_params(params, *, mxu_width=None):
    """Fold the 12 circular transpositions into the lane (feature) axis and
    build MXU-width-matched root-group weights.  One-time transformation.

      w0 (12, 12*C)          : w0[p, r*C+c] = conv_w[(p - r) % 12, c]  (dense)
      w1 (12*C, 12*H)        : block-diagonal copies of the input Linear
      w_hid[s] (L,s*H,s*H)   : block-diagonal copies for each distinct group size
      w_out (12*H, 12*K)     : block-diagonal copies of the output Linear
      biases tiled 12x along the lane axis.
    Weights cast to bf16 (MXU inputs), biases kept f32."""
    cw, cb = params["conv_w"], params["conv_b"]      # (12, C), (1, C)
    wi, bi = params["w_in"], params["b_in"]          # (C, H), (1, H)
    wh, bh = params["w_hid"], params["b_hid"]        # (L, H, H), (L, H)
    wo, bo = params["w_out"], params["b_out"]        # (H, K), (1, K)
    C, H, K = cw.shape[1], wi.shape[1], wo.shape[1]
    L = wh.shape[0]

    if mxu_width is None:
        mxu_width = _mxu_lane_width()
    groups = _make_groups(H, mxu_width)              # e.g. (8,4) v6e/v7x, (4,4,4) v5e
    sizes = tuple(sorted(set(groups), reverse=True))

    pidx = jnp.arange(P)[:, None]
    ridx = jnp.arange(P)[None, :]
    w0 = cw[(pidx - ridx) % P].reshape(P, P * C)                     # (12, 12C)

    eyeP = jnp.eye(P, dtype=jnp.float32)
    w1f = jnp.einsum("rs,ch->rcsh", eyeP, wi).reshape(P * C, P * H)
    wof = jnp.einsum("rs,hk->rhsk", eyeP, wo).reshape(P * H, P * K)

    wh_list = []
    for s in sizes:
        eye_s = jnp.eye(s, dtype=jnp.float32)
        wh_list.append(jnp.einsum("ab,lij->laibj", eye_s, wh)
                       .reshape(L, s * H, s * H).astype(jnp.bfloat16))

    bf16, f32 = jnp.bfloat16, jnp.float32
    return dict(
        groups=groups, sizes=sizes,
        w0=w0.astype(bf16), b0=jnp.tile(cb, (1, P)).astype(f32),
        w1=w1f.astype(bf16), b1=jnp.tile(bi, (1, P)).astype(f32),
        w_hid=wh_list, b_hid=jnp.tile(bh, (1, P)).astype(f32),
        w_out=wof.astype(bf16), b_out=jnp.tile(bo, (1, P)).astype(f32),
    )


def ti_cnn_forward(data, folded, *, num_hidden, tile_b=1024,
                   out_dtype=jnp.bfloat16, min_grid_steps=4):
    """data: (batch, 12) f32 pitch vectors -> (batch, 12*num_chord_types) out_dtype."""
    batch, p = data.shape
    assert p == P, "pitch_vector_length is hard-coded to 12 by the forward pass"

    groups, sizes = folded["groups"], folded["sizes"]
    w0, b0 = folded["w0"], folded["b0"]
    w1, b1 = folded["w1"], folded["b1"]
    wh_list, bh = folded["w_hid"], folded["b_hid"]
    wo, bo = folded["w_out"], folded["b_out"]
    F0, F1, F2 = w0.shape[1], b1.shape[1], bo.shape[1]
    H, K = F1 // P, F2 // P
    assert all(w.shape[0] == num_hidden for w in wh_list)

    # Batch tiling: tb is a multiple of 16 (bf16 output needs (16,128) sublane
    # packing) and capped so the grid has >= min_grid_steps steps, keeping the
    # input/output DMA software-pipelined and giving both v7x TensorCores work
    # via the "parallel" batch axis.  tile_b=1024 keeps live activations +
    # double-buffered I/O + resident weights well under the scoped VMEM limit;
    # on v5e/v6e (128 MiB VMEM) tile_b can be raised to 4-8K with the limit.
    tb = min(tile_b, _round_up(pl.cdiv(batch, min_grid_steps), 16))
    tb = _round_up(max(tb, 16), 16)
    padded = _round_up(batch, tb)
    x = data if padded == batch else jnp.pad(data, ((0, padded - batch), (0, 0)))
    grid = (padded // tb,)

    mm_flops_per_row = 2 * (P * F0 + F0 * F1
                            + num_hidden * sum((g * H) ** 2 for g in groups)
                            + F1 * F2)
    out_bytes = np.dtype(out_dtype).itemsize
    weight_bytes = 2 * (w0.size + w1.size + sum(w.size for w in wh_list) + wo.size)
    bias_bytes = 4 * (b0.size + b1.size + bh.size + bo.size)
    bytes_accessed = x.size * 4 + padded * F2 * out_bytes + weight_bytes + bias_bytes

    def _const_spec(arr):
        nd = arr.ndim
        return pl.BlockSpec(arr.shape, lambda i, _z=(0,) * nd: _z)

    weight_args = [w0, b0, w1, b1, *wh_list, bh, wo, bo]
    in_specs = ([pl.BlockSpec((tb, P), lambda i: (i, 0))]        # streamed f32 input
                + [_const_spec(a) for a in weight_args])         # VMEM-resident params

    kernel = functools.partial(_ti_cnn_kernel, groups=groups, sizes=sizes,
                               num_hidden=num_hidden, hidden_size=H)
    out = pl.pallas_call(
        kernel,
        out_shape=jax.ShapeDtypeStruct((padded, F2), out_dtype),
        grid=grid,
        in_specs=in_specs,
        out_specs=pl.BlockSpec((tb, F2), lambda i: (i, 0)),      # lane-dense output
        compiler_params=pltpu.CompilerParams(
            dimension_semantics=("parallel",),                   # 2 TCs on v7x
            vmem_limit_bytes=32 * 1024 * 1024),
        cost_estimate=pl.CostEstimate(flops=int(padded * mm_flops_per_row),
                                      transcendentals=0,
                                      bytes_accessed=int(bytes_accessed)),
    )(x, *weight_args)

    return out[:batch]


def init_params(key, *, num_input_channels=1, pitch_vector_length=12,
                num_conv_channels=8, num_hidden=1, hidden_size=32,
                num_chord_types=16):
    """Deterministic synthetic parameters (PyTorch-default-like uniform init)."""
    Pv, C, H, K = pitch_vector_length, num_conv_channels, hidden_size, num_chord_types
    ks = jax.random.split(key, 8)

    def u(k, shape, fan_in):
        bound = 1.0 / np.sqrt(fan_in)
        return jax.random.uniform(k, shape, jnp.float32, -bound, bound)

    return dict(
        conv_w=u(ks[0], (Pv, C), Pv * num_input_channels),   # conv.weight[:,0,:].T
        conv_b=u(ks[1], (1, C), Pv * num_input_channels),
        w_in=u(ks[2], (C, H), C),                            # input.weight.T
        b_in=u(ks[3], (1, H), C),
        w_hid=u(ks[4], (num_hidden, H, H), H),               # linear[l].weight.T
        b_hid=u(ks[5], (num_hidden, H), H),
        w_out=u(ks[6], (H, K), H),                           # output.weight.T
        b_out=u(ks[7], (1, K), H),
    )


def reference_forward(data, params, *, num_hidden):
    """Pure-JAX reference using the original (unfolded) per-root structure.

    Mirrors the kernel's numerics (bf16 weights/activations, f32 accumulation,
    f32 bias/ReLU) so the correctness check is tight; it also independently
    validates the circulant fold and the root-group block-diagonal weights."""
    def q(x):  # bf16 quantize, compute in f32
        return x.astype(jnp.bfloat16).astype(jnp.float32)

    batch, p = data.shape
    idx = (jnp.arange(p)[:, None] + jnp.arange(p)[None, :]) % p
    x = q(data)[:, idx].reshape(batch * p, p)
    h = jax.nn.relu(x @ q(params["conv_w"]) + params["conv_b"])
    h = jax.nn.relu(q(h) @ q(params["w_in"]) + params["b_in"])
    for layer in range(num_hidden):
        h = jax.nn.relu(q(h) @ q(params["w_hid"][layer])
                        + params["b_hid"][layer:layer + 1])
    out = jax.nn.relu(q(h) @ q(params["w_out"]) + params["b_out"])
    return out.reshape(batch, p * out.shape[-1])


if __name__ == "__main__":
    NUM_HIDDEN = 1
    key = jax.random.PRNGKey(0)
    k_param, k_data = jax.random.split(key)

    params = init_params(k_param, num_conv_channels=8, num_hidden=NUM_HIDDEN,
                         hidden_size=32, num_chord_types=16)
    folded = fold_params(params)

    # batch=260 -> tb=80 (multiple of 16), padded to 320, a 4-step pipelined grid.
    data = jax.random.normal(k_data, (260, 12), dtype=jnp.float32)

    out = jax.block_until_ready(ti_cnn_forward(data, folded, num_hidden=NUM_HIDDEN))
    ref = jax.block_until_ready(reference_forward(data, params,
                                                  num_hidden=NUM_HIDDEN))

    out_f32 = np.asarray(out.astype(jnp.float32))
    ref_bf16 = np.asarray(ref.astype(jnp.bfloat16).astype(jnp.float32))
    np.testing.assert_allclose(out_f32, ref_bf16, rtol=1e-2, atol=1e-2)

    print("KERNEL_OK")
</pallas_src>

<mosaic_0001>
module attributes {stable_mosaic.version = 11 : i64} {
  func.func @_ti_cnn_kernel(%arg0: i32, %arg1: memref<80x12xf32, #tpu.memory_space<vmem>>, %arg2: memref<12x96xbf16, #tpu.memory_space<vmem>>, %arg3: memref<1x96xf32, #tpu.memory_space<vmem>>, %arg4: memref<96x384xbf16, #tpu.memory_space<vmem>>, %arg5: memref<1x384xf32, #tpu.memory_space<vmem>>, %arg6: memref<1x256x256xbf16, #tpu.memory_space<vmem>>, %arg7: memref<1x128x128xbf16, #tpu.memory_space<vmem>>, %arg8: memref<1x384xf32, #tpu.memory_space<vmem>>, %arg9: memref<384x192xbf16, #tpu.memory_space<vmem>>, %arg10: memref<1x192xf32, #tpu.memory_space<vmem>>, %arg11: memref<80x192xbf16, #tpu.memory_space<vmem>>) attributes {dimension_semantics = [#tpu.dimension_semantics<parallel>], iteration_bounds = array<i64: 4>, scalar_prefetch = 0 : i64, scratch_operands = 0 : i64, tpu.core_type = #tpu.core_type<tc>, window_params = [{transform_indices = @transform_0, window_bounds = array<i64: 80, 12>}, {pipeline_mode = #tpu.pipeline_mode<synchronous>, transform_indices = @transform_1, window_bounds = array<i64: 12, 96>}, {pipeline_mode = #tpu.pipeline_mode<synchronous>, transform_indices = @transform_2, window_bounds = array<i64: 1, 96>}, {pipeline_mode = #tpu.pipeline_mode<synchronous>, transform_indices = @transform_3, window_bounds = array<i64: 96, 384>}, {pipeline_mode = #tpu.pipeline_mode<synchronous>, transform_indices = @transform_4, window_bounds = array<i64: 1, 384>}, {pipeline_mode = #tpu.pipeline_mode<synchronous>, transform_indices = @transform_5, window_bounds = array<i64: 1, 256, 256>}, {pipeline_mode = #tpu.pipeline_mode<synchronous>, transform_indices = @transform_6, window_bounds = array<i64: 1, 128, 128>}, {pipeline_mode = #tpu.pipeline_mode<synchronous>, transform_indices = @transform_7, window_bounds = array<i64: 1, 384>}, {pipeline_mode = #tpu.pipeline_mode<synchronous>, transform_indices = @transform_8, window_bounds = array<i64: 384, 192>}, {pipeline_mode = #tpu.pipeline_mode<synchronous>, transform_indices = @transform_9, window_bounds = array<i64: 1, 192>}, {transform_indices = @transform_10, window_bounds = array<i64: 80, 192>}]} {
    %c0 = arith.constant 0 : index
    %c0_0 = arith.constant 0 : index
    %0 = vector.load %arg1[%c0, %c0_0] : memref<80x12xf32, #tpu.memory_space<vmem>>, vector<80x12xf32>
    %1 = arith.truncf %0 : vector<80x12xf32> to vector<80x12xbf16>
    %c0_1 = arith.constant 0 : index
    %c0_2 = arith.constant 0 : index
    %2 = vector.load %arg2[%c0_1, %c0_2] : memref<12x96xbf16, #tpu.memory_space<vmem>>, vector<12x96xbf16>
    %cst = arith.constant dense<0.000000e+00> : vector<80x96xf32>
    %3 = tpu.matmul %1, %2, %cst {dimension_numbers = #tpu.dot_dimension_numbers<[1], [0], [0], [1], [0, 0, 1, 1], [], []>} : vector<80x12xbf16>, vector<12x96xbf16>, vector<80x96xf32> -> vector<80x96xf32>
    %c0_3 = arith.constant 0 : index
    %c0_4 = arith.constant 0 : index
    %4 = vector.load %arg3[%c0_3, %c0_4] : memref<1x96xf32, #tpu.memory_space<vmem>>, vector<1x96xf32>
    %5 = vector.broadcast %4 : vector<1x96xf32> to vector<80x96xf32>
    %6 = arith.addf %3, %5 : vector<80x96xf32>
    %cst_5 = arith.constant 0.000000e+00 : f32
    %7 = vector.broadcast %cst_5 : f32 to vector<80x96xf32>
    %8 = arith.maximumf %6, %7 : vector<80x96xf32>
    %9 = arith.truncf %8 : vector<80x96xf32> to vector<80x96xbf16>
    %c0_6 = arith.constant 0 : index
    %c0_7 = arith.constant 0 : index
    %10 = vector.load %arg4[%c0_6, %c0_7] : memref<96x384xbf16, #tpu.memory_space<vmem>>, vector<96x384xbf16>
    %cst_8 = arith.constant dense<0.000000e+00> : vector<80x384xf32>
    %11 = tpu.matmul %9, %10, %cst_8 {dimension_numbers = #tpu.dot_dimension_numbers<[1], [0], [0], [1], [0, 0, 1, 1], [], []>} : vector<80x96xbf16>, vector<96x384xbf16>, vector<80x384xf32> -> vector<80x384xf32>
    %c0_9 = arith.constant 0 : index
    %c0_10 = arith.constant 0 : index
    %12 = vector.load %arg5[%c0_9, %c0_10] : memref<1x384xf32, #tpu.memory_space<vmem>>, vector<1x384xf32>
    %13 = vector.broadcast %12 : vector<1x384xf32> to vector<80x384xf32>
    %14 = arith.addf %11, %13 : vector<80x384xf32>
    %cst_11 = arith.constant 0.000000e+00 : f32
    %15 = vector.broadcast %cst_11 : f32 to vector<80x384xf32>
    %16 = arith.maximumf %14, %15 : vector<80x384xf32>
    %17 = vector.extract_strided_slice %16 {offsets = [0, 0], sizes = [80, 256], strides = [1, 1]} : vector<80x384xf32> to vector<80x256xf32>
    %18 = vector.extract_strided_slice %16 {offsets = [0, 256], sizes = [80, 128], strides = [1, 1]} : vector<80x384xf32> to vector<80x128xf32>
    %c0_12 = arith.constant 0 : index
    %c0_13 = arith.constant 0 : index
    %c0_14 = arith.constant 0 : index
    %19 = vector.load %arg6[%c0_12, %c0_13, %c0_14] : memref<1x256x256xbf16, #tpu.memory_space<vmem>>, vector<1x256x256xbf16>
    %20 = vector.shape_cast %19 : vector<1x256x256xbf16> to vector<256x256xbf16>
    %c0_15 = arith.constant 0 : index
    %c0_16 = arith.constant 0 : index
    %c0_17 = arith.constant 0 : index
    %21 = vector.load %arg7[%c0_15, %c0_16, %c0_17] : memref<1x128x128xbf16, #tpu.memory_space<vmem>>, vector<1x128x128xbf16>
    %22 = vector.shape_cast %21 : vector<1x128x128xbf16> to vector<128x128xbf16>
    %c0_18 = arith.constant 0 : index
    %c0_19 = arith.constant 0 : index
    %23 = vector.load %arg8[%c0_18, %c0_19] : memref<1x384xf32, #tpu.memory_space<vmem>>, vector<1x256xf32>
    %24 = arith.truncf %17 : vector<80x256xf32> to vector<80x256xbf16>
    %cst_20 = arith.constant dense<0.000000e+00> : vector<80x256xf32>
    %25 = tpu.matmul %24, %20, %cst_20 {dimension_numbers = #tpu.dot_dimension_numbers<[1], [0], [0], [1], [0, 0, 1, 1], [], []>} : vector<80x256xbf16>, vector<256x256xbf16>, vector<80x256xf32> -> vector<80x256xf32>
    %26 = vector.broadcast %23 : vector<1x256xf32> to vector<80x256xf32>
    %27 = arith.addf %25, %26 : vector<80x256xf32>
    %cst_21 = arith.constant 0.000000e+00 : f32
    %28 = vector.broadcast %cst_21 : f32 to vector<80x256xf32>
    %29 = arith.maximumf %27, %28 : vector<80x256xf32>
    %c0_22 = arith.constant 0 : index
    %c256 = arith.constant 256 : index
    %30 = vector.load %arg8[%c0_22, %c256] : memref<1x384xf32, #tpu.memory_space<vmem>>, vector<1x128xf32>
    %31 = arith.truncf %18 : vector<80x128xf32> to vector<80x128xbf16>
    %cst_23 = arith.constant dense<0.000000e+00> : vector<80x128xf32>
    %32 = tpu.matmul %31, %22, %cst_23 {dimension_numbers = #tpu.dot_dimension_numbers<[1], [0], [0], [1], [0, 0, 1, 1], [], []>} : vector<80x128xbf16>, vector<128x128xbf16>, vector<80x128xf32> -> vector<80x128xf32>
    %33 = vector.broadcast %30 : vector<1x128xf32> to vector<80x128xf32>
    %34 = arith.addf %32, %33 : vector<80x128xf32>
    %cst_24 = arith.constant 0.000000e+00 : f32
    %35 = vector.broadcast %cst_24 : f32 to vector<80x128xf32>
    %36 = arith.maximumf %34, %35 : vector<80x128xf32>
    %c0_25 = arith.constant 0 : index
    %c0_26 = arith.constant 0 : index
    %37 = vector.load %arg9[%c0_25, %c0_26] : memref<384x192xbf16, #tpu.memory_space<vmem>>, vector<256x192xbf16>
    %38 = arith.truncf %29 : vector<80x256xf32> to vector<80x256xbf16>
    %cst_27 = arith.constant dense<0.000000e+00> : vector<80x192xf32>
    %39 = tpu.matmul %38, %37, %cst_27 {dimension_numbers = #tpu.dot_dimension_numbers<[1], [0], [0], [1], [0, 0, 1, 1], [], []>} : vector<80x256xbf16>, vector<256x192xbf16>, vector<80x192xf32> -> vector<80x192xf32>
    %c256_28 = arith.constant 256 : index
    %c0_29 = arith.constant 0 : index
    %40 = vector.load %arg9[%c256_28, %c0_29] : memref<384x192xbf16, #tpu.memory_space<vmem>>, vector<128x192xbf16>
    %41 = arith.truncf %36 : vector<80x128xf32> to vector<80x128xbf16>
    %cst_30 = arith.constant dense<0.000000e+00> : vector<80x192xf32>
    %42 = tpu.matmul %41, %40, %cst_30 {dimension_numbers = #tpu.dot_dimension_numbers<[1], [0], [0], [1], [0, 0, 1, 1], [], []>} : vector<80x128xbf16>, vector<128x192xbf16>, vector<80x192xf32> -> vector<80x192xf32>
    %43 = arith.addf %39, %42 : vector<80x192xf32>
    %c0_31 = arith.constant 0 : index
    %c0_32 = arith.constant 0 : index
    %44 = vector.load %arg10[%c0_31, %c0_32] : memref<1x192xf32, #tpu.memory_space<vmem>>, vector<1x192xf32>
    %45 = vector.broadcast %44 : vector<1x192xf32> to vector<80x192xf32>
    %46 = arith.addf %43, %45 : vector<80x192xf32>
    %cst_33 = arith.constant 0.000000e+00 : f32
    %47 = vector.broadcast %cst_33 : f32 to vector<80x192xf32>
    %48 = arith.maximumf %46, %47 : vector<80x192xf32>
    %49 = arith.truncf %48 : vector<80x192xf32> to vector<80x192xbf16>
    %c0_34 = arith.constant 0 : index
    %c0_35 = arith.constant 0 : index
    %50 = vector.load %arg11[%c0_34, %c0_35] : memref<80x192xbf16, #tpu.memory_space<vmem>>, vector<80x192xbf16>
    tpu.vector_store %arg11[%c0_34, %c0_35], %49 {strides = array<i32>} : memref<80x192xbf16, #tpu.memory_space<vmem>>, vector<80x192xbf16>,
    return
  }
  func.func @transform_0(%arg0: i32) -> (i32, i32) {
    %c0_i32 = arith.constant 0 : i32
    %c0_i32_0 = arith.constant 0 : i32
    return %arg0, %c0_i32 : i32, i32
  }
  func.func @transform_1(%arg0: i32) -> (i32, i32) {
    %c0_i32 = arith.constant 0 : i32
    %c0_i32_0 = arith.constant 0 : i32
    %c0_i32_1 = arith.constant 0 : i32
    return %c0_i32, %c0_i32_0 : i32, i32
  }
  func.func @transform_2(%arg0: i32) -> (i32, i32) {
    %c0_i32 = arith.constant 0 : i32
    %c0_i32_0 = arith.constant 0 : i32
    %c0_i32_1 = arith.constant 0 : i32
    return %c0_i32, %c0_i32_0 : i32, i32
  }
  func.func @transform_3(%arg0: i32) -> (i32, i32) {
    %c0_i32 = arith.constant 0 : i32
    %c0_i32_0 = arith.constant 0 : i32
    %c0_i32_1 = arith.constant 0 : i32
    return %c0_i32, %c0_i32_0 : i32, i32
  }
  func.func @transform_4(%arg0: i32) -> (i32, i32) {
    %c0_i32 = arith.constant 0 : i32
    %c0_i32_0 = arith.constant 0 : i32
    %c0_i32_1 = arith.constant 0 : i32
    return %c0_i32, %c0_i32_0 : i32, i32
  }
  func.func @transform_5(%arg0: i32) -> (i32, i32, i32) {
    %c0_i32 = arith.constant 0 : i32
    %c0_i32_0 = arith.constant 0 : i32
    %c0_i32_1 = arith.constant 0 : i32
    %c0_i32_2 = arith.constant 0 : i32
    return %c0_i32, %c0_i32_0, %c0_i32_1 : i32, i32, i32
  }
  func.func @transform_6(%arg0: i32) -> (i32, i32, i32) {
    %c0_i32 = arith.constant 0 : i32
    %c0_i32_0 = arith.constant 0 : i32
    %c0_i32_1 = arith.constant 0 : i32
    %c0_i32_2 = arith.constant 0 : i32
    return %c0_i32, %c0_i32_0, %c0_i32_1 : i32, i32, i32
  }
  func.func @transform_7(%arg0: i32) -> (i32, i32) {
    %c0_i32 = arith.constant 0 : i32
    %c0_i32_0 = arith.constant 0 : i32
    %c0_i32_1 = arith.constant 0 : i32
    return %c0_i32, %c0_i32_0 : i32, i32
  }
  func.func @transform_8(%arg0: i32) -> (i32, i32) {
    %c0_i32 = arith.constant 0 : i32
    %c0_i32_0 = arith.constant 0 : i32
    %c0_i32_1 = arith.constant 0 : i32
    return %c0_i32, %c0_i32_0 : i32, i32
  }
  func.func @transform_9(%arg0: i32) -> (i32, i32) {
    %c0_i32 = arith.constant 0 : i32
    %c0_i32_0 = arith.constant 0 : i32
    %c0_i32_1 = arith.constant 0 : i32
    return %c0_i32, %c0_i32_0 : i32, i32
  }
  func.func @transform_10(%arg0: i32) -> (i32, i32) {
    %c0_i32 = arith.constant 0 : i32
    %c0_i32_0 = arith.constant 0 : i32
    return %arg0, %c0_i32 : i32, i32
  }
}

</mosaic_0001>

<bundles_post_ra>
// kernel: tpu_custom_call.1
= control target key start
LH: loop header
LB: loop body
LE: loop exit
PB: predicated region body
PF: predicated region fallthrough
CT: control target
= control target key end

     0   :  { %s2497_s13 = smov 0   ;;  %s3126_s0 = inlined_call_operand.vmem [shape: f32[320,12], index: 0, kind: input, shape index: {}]   ;;  %s3127_s1 = inlined_call_operand.vmem [shape: bf16[12,96], index: 1, kind: input, shape index: {}]   ;;  %s3128_s2 = inlined_call_operand.vmem [shape: f32[1,96], index: 2, kind: input, shape index: {}]   ;;  %s3129_s3 = inlined_call_operand.vmem [shape: bf16[96,384], index: 3, kind: input, shape index: {}]   ;;  %s3130_s4 = inlined_call_operand.vmem [shape: f32[1,384], index: 4, kind: input, shape index: {}]   ;;  %s3131_s5 = inlined_call_operand.vmem [shape: bf16[1,256,256], index: 5, kind: input, shape index: {}]   ;;  %s3132_s6 = inlined_call_operand.vmem [shape: bf16[1,128,128], index: 6, kind: input, shape index: {}]   ;;  %s3133_s7 = inlined_call_operand.vmem [shape: f32[1,384], index: 7, kind: input, shape index: {}]   ;;  %s3134_s8 = inlined_call_operand.vmem [shape: bf16[384,192], index: 8, kind: input, shape index: {}]   ;;  %s3135_s9 = inlined_call_operand.vmem [shape: f32[1,192], index: 9, kind: input, shape index: {}]   ;;  %s3136_s10 = inlined_call_operand.vmem [shape: bf16[320,192], index: 10, kind: output, shape index: {}]  }
   0x1 LB: > { %s1970_s14 = sadd.s32 4294967295, %s2437_s13   ;;  %p1974_p0 = scmp.ge.s32.totalorder %s2437_s13, 1  ;;  %s2437_s13 = sphi %s2497_s13, %s20_s13  }
   0x2   : > { %p313_p1 = scmp.lt.s32.totalorder %s2437_s13, 5 }
   0x4   : > { %p314_p2 = pnand %p1974_p0, %p313_p1 }
   0x5   : > { %vm411_vm0 = vcmask (!%p314_p2), 1045504   ;;  %v2439_v0 = vmov (!%p314_p2), 0.0   ;;  %v2278_v1 = vld [vmem:[%s3127_s1] sm:$0x3f] (!%p314_p2)   ;;  %s352_s17 = smul.u32 (!%p314_p2), 10, %s1970_s14  ;;  %vm2440_vm1 = vmmov (!%p314_p2), 0  }
   0x6   : > { %317 = sbr.rel (%p314_p2) target bundleno = 1037 (0x40d), region = 60  ;;  %2155 = vmatprep.subr.bf16.mxu0 (!%p314_p2), %v2439_v0  ;;  %2245 = vmatprep.subr.bf16.mxu1 (!%p314_p2), %v2439_v0  ;;  %v2281_v2 = vld [vmem:[%s3129_s3 + $0x4] ss:$12 sps:$4 sm:$0xff] (!%p314_p2)   ;;  %v413_v3 = vsel (!%p314_p2), %vm411_vm0, %v2278_v1, 0  ;;  %vm395_vm2 = vcmask (!%p314_p2), 97280   ;;  %v2441_v30 = vmov (!%p314_p2), 0  }
   0x7   : > { %2157 = vmatprep.mubr.msk.bf16.mxu0 (!%p314_p2), %vm2440_vm1, %v2439_v0  ;;  %2173 = vmatprep.mubr.msk.bf16.mxu1 (!%p314_p2), %vm2440_vm1, %v2439_v0  ;;  %p353_p3 = scmp.lt.s32.totalorder (!%p314_p2), %s352_s17, 39  ;;  %v2279_v7 = vld [vmem:[%s3129_s3] ss:$12 sps:$4 sm:$0xff] (!%p314_p2)   ;;  %v2284_v11 = vld [vmem:[%s3129_s3 + $0x1c] ss:$12 sps:$4 sm:$0xff] (!%p314_p2)   ;;  %vm640_vm3 = vcmask (!%p314_p2), 785408  }
   0x8   : > { %2156 = vmatpush3.bf16.msra.mxu0 (!%p314_p2), %v413_v3  ;;  %2246 = vmatpush3.bf16.msra.mxu1 (!%p314_p2), %v413_v3  ;;  %v2282_v14 = vld [vmem:[%s3129_s3 + $0x18] ss:$12 sps:$4 sm:$0xff] (!%p314_p2)   ;;  %v2287_v15 = vld [vmem:[%s3129_s3 + $0x34] ss:$12 sps:$4 sm:$0xff] (!%p314_p2)   ;;  %v2285_v17 = vld [vmem:[%s3129_s3 + $0x30] ss:$12 sps:$4 sm:$0xff] (!%p314_p2)  }
   0x9   : > { %656 = vmatprep.subr.bf16.mxu1 (!%p314_p2), %v2281_v2  ;;  %2209 = vmatprep.subr.bf16.mxu0 (!%p314_p2), %v2439_v0  ;;  %v2290_v20 = vld [vmem:[%s3129_s3 + $0x4c] ss:$12 sps:$4 sm:$0xff] (!%p314_p2)   ;;  %v2288_v21 = vld [vmem:[%s3129_s3 + $0x48] ss:$12 sps:$4 sm:$0xff] (!%p314_p2)   ;;  %v2293_v26 = vld [vmem:[%s3129_s3 + $0x64] ss:$12 sps:$4 sm:$0xff] (!%p314_p2)  }
   0xa   : > { %v2291_v27 = vld [vmem:[%s3129_s3 + $0x60] ss:$12 sps:$4 sm:$0xff] (!%p314_p2)   ;;  %v2296_v28 = vld [vmem:[%s3129_s3 + $0x7c] ss:$12 sps:$4 sm:$0xff] (!%p314_p2)   ;;  %v2294_v29 = vld [vmem:[%s3129_s3 + $0x78] ss:$12 sps:$4 sm:$0xff] (!%p314_p2)  }
   0xb   : > { %v2589_v31 = vld [vmem:[%s3128_s2] ss:$0 sm:$0xff] (!%p314_p2)  ;;  %v2297_v44 = vld [vmem:[%s3129_s3 + $0x8] ss:$12 sps:$4 sm:$0xff] (!%p314_p2)   ;;  %v2299_v60 = vld [vmem:[%s3129_s3 + $0x38] ss:$12 sps:$4 sm:$0xff] (!%p314_p2)  }
   0xc   : > { %v2298_v54 = vld [vmem:[%s3129_s3 + $0x20] ss:$12 sps:$4 sm:$0xff] (!%p314_p2)   ;;  %v2300_v3 = vld [vmem:[%s3129_s3 + $0x50] ss:$12 sps:$4 sm:$0xff] (!%p314_p2)   ;;  %vm1899_vm4 = vcmask (!%p314_p2), 1043456   ;;  %vm1900_vm5 = vcmask (!%p314_p2), 523268  }
   0xd   : > { %s3140_s17 = smov (!%p353_p3, %s352_s17), 39  ;;  %vm3073_vm6 = vmor %vm1900_vm5, %vm1899_vm4 }
   0xe   : > { %s1975_s20 = sshll.u32 %s3140_s17, 3 }
   0xf   : > { %s2526_s23 = scalar_lea.vmem %s3126_s0, %s1975_s20 }
  0x10   : > { %v366_v4 = vld [vmem:[%s2526_s23] sm:$0xff]  ;;  %v367_v5 = vld [vmem:[%s2526_s23 + $0x8] sm:$0xff]  ;;  %v368_v8 = vld [vmem:[%s2526_s23 + $0x10] sm:$0xff] }
  0x11   : > { %v376_v6 = vpack.c.bf16 %v367_v5, %v366_v4  ;;  %v369_v9 = vld [vmem:[%s2526_s23 + $0x18] sm:$0xff]  ;;  %v374_v10 = vld [vmem:[%s2526_s23 + $0x40] sm:$0xff]  ;;  %v375_v12 = vld [vmem:[%s2526_s23 + $0x48] sm:$0xff] }
  0x12   : > { %v380_v13 = vpack.c.bf16 %v375_v12, %v374_v10  ;;  %v377_v16 = vpack.c.bf16 %v369_v9, %v368_v8  ;;  %v370_v18 = vld [vmem:[%s2526_s23 + $0x20] sm:$0xff]  ;;  %v371_v19 = vld [vmem:[%s2526_s23 + $0x28] sm:$0xff]  ;;  %v372_v23 = vld [vmem:[%s2526_s23 + $0x30] sm:$0xff] }
  0x13   : > { %2158 = vmatmul.mubr.msk.bf16.vlgmr.msra.gmra.mrb[0].mxu0 %vm395_vm2, %v376_v6  ;;  %v378_v22 = vpack.c.bf16 %v371_v19, %v370_v18  ;;  %v373_v24 = vld [vmem:[%s2526_s23 + $0x38] sm:$0xff]  ;;  %v2301_v8 = vld [vmem:[%s3129_s3 + $0x68] ss:$12 sps:$4 sm:$0xff]   ;;  %s3071_s23 = scalar_lea.vmem %s3136_s10, %s1975_s20 }
  0x14   : > { %2161 = vmatprep.mubr.msk.bf16.mxu0 %vm2440_vm1, %v2439_v0  ;;  %2174 = vmatmul.mubr.msk.bf16.vlgmr.msra.gmra.mrb[0].mxu1 %vm395_vm2, %v380_v13  ;;  %v379_v25 = vpack.c.bf16 %v373_v24, %v372_v23  ;;  %v2306_v23 = vld [vmem:[%s3131_s5 + $0x10] ss:$8 sps:$4 sm:$0xff]   ;;  %v2311_v24 = vld [vmem:[%s3131_s5 + $0x24] ss:$8 sps:$4 sm:$0xff]  }
  0x15   : > { %657 = vmatpush1.bf16.msra.mxu1 %v2279_v7  ;;  %688 = vmatprep.mubr.bf16.mxu1 %v2441_v30 }
  0x16   : > { %658 = vmatprep.subr.bf16.mxu1 %v2284_v11 }
  0x19   : > { %659 = vmatpush1.bf16.msra.mxu1 %v2282_v14  ;;  %v2302_v14 = vld [vmem:[%s3129_s3 + $0x80] ss:$12 sps:$4 sm:$0xff]  }
  0x1a   : > { %660 = vmatprep.subr.bf16.mxu1 %v2287_v15 }
  0x1b   : > { %2162 = vmatmul.mubr.msk.bf16.gmra.mrb[4].mxu0 %vm395_vm2, %v377_v16 }
  0x1c   : > { %2165 = vmatprep.mubr.msk.bf16.mxu0 %vm2440_vm1, %v2439_v0 }
  0x1d   : > { %661 = vmatpush1.bf16.msra.mxu1 %v2285_v17  ;;  %v2305_v17 = vld [vmem:[%s3131_s5 + $0x4] ss:$8 sps:$4 sm:$0xff]  }
  0x1e   : > { %662 = vmatprep.subr.bf16.mxu1 %v2290_v20 }
  0x21   : > { %663 = vmatpush1.bf16.msra.mxu1 %v2288_v21  ;;  %v2303_v21 = vld [vmem:[%s3131_s5] ss:$8 sps:$4 sm:$0xff]  }
  0x22   : > { %664 = vmatprep.subr.bf16.mxu1 %v2293_v26  ;;  %v2314_v26 = vld [vmem:[%s3131_s5 + $0x34] ss:$8 sps:$4 sm:$0xff]  }
  0x23   : > { %2166 = vmatmul.mubr.msk.bf16.gmra.mrb[8].mxu0 %vm395_vm2, %v378_v22  ;;  %v2308_v22 = vld [vmem:[%s3131_s5 + $0x14] ss:$8 sps:$4 sm:$0xff]  }
  0x24   : > { %2169 = vmatprep.mubr.msk.bf16.mxu0 %vm2440_vm1, %v2439_v0 }
  0x25   : > { %665 = vmatpush1.bf16.msra.mxu1 %v2291_v27  ;;  %v2312_v27 = vld [vmem:[%s3131_s5 + $0x30] ss:$8 sps:$4 sm:$0xff]  }
  0x26   : > { %666 = vmatprep.subr.bf16.mxu1 %v2296_v28  ;;  %v2317_v28 = vld [vmem:[%s3131_s5 + $0x44] ss:$8 sps:$4 sm:$0xff]  }
  0x29   : > { %667 = vmatpush1.bf16.msra.mxu1 %v2294_v29  ;;  %v2315_v29 = vld [vmem:[%s3131_s5 + $0x40] ss:$8 sps:$4 sm:$0xff]  }
  0x2a   : > { %2177 = vmatprep.subr.bf16.mxu1 %v2439_v0 }
  0x2b   : > { %2170 = vmatmul.mubr.msk.bf16.gmra.mrb[12].mxu0 %vm395_vm2, %v379_v25  ;;  %v2309_v25 = vld [vmem:[%s3131_s5 + $0x20] ss:$8 sps:$4 sm:$0xff]  }
  0x2c   : > { %2225 = vmatprep.mubr.msk.bf16.mxu0 %vm2440_vm1, %v2439_v0 }
  0xe6   : > { %v449_v32 = vpop.f32.mrb[0].mxu0 }
  0xe7   : > { %v450_v33 = vadd.f32 %v2589_v31, %v449_v32  ;;  %v2159_v34 = vpop.f32.mrb[1].mxu0  ;;  %v481_v38 = vpop.f32.mrb[0].mxu1  ;;  %v2318_v32 = vld [vmem:[%s3131_s5 + $0x50] ss:$8 sps:$4 sm:$0xff]  }
  0xe8   : > { %v452_v35 = vpop.f32.mrb[2].mxu0  ;;  %v482_v39 = vadd.f32 %v2589_v31, %v481_v38  ;;  %v2175_v40 = vpop.f32.mrb[1].mxu1  ;;  %v2321_v34 = vld [vmem:[%s3131_s5 + $0x60] ss:$8 sps:$4 sm:$0xff]  }
  0xe9   : > { %v453_v36 = vadd.f32 %v2589_v31, %v452_v35  ;;  %v2160_v37 = vpop.f32.mrb[3].mxu0  ;;  %v488_v41 = vmax.f32 %v450_v33, 0.0  ;;  %v484_v43 = vpop.f32.mrb[2].mxu1  ;;  %v2323_v33 = vld [vmem:[%s3131_s5 + $0x64] ss:$8 sps:$4 sm:$0xff]  }
  0xea   : > { %v496_v45 = vmax.f32 %v482_v39, 0.0  ;;  %v485_v46 = vadd.f32 %v2589_v31, %v484_v43  ;;  %v2176_v47 = vpop.f32.mrb[3].mxu1  ;;  %v2326_v35 = vld [vmem:[%s3131_s5 + $0x74] ss:$8 sps:$4 sm:$0xff]   ;;  %v2329_v37 = vld [vmem:[%s3131_s5 + $0x84] ss:$8 sps:$4 sm:$0xff]  }
  0xeb   : > { %v489_v42 = vmax.f32 %v453_v36, 0.0  ;;  %v2324_v36 = vld [vmem:[%s3131_s5 + $0x70] ss:$8 sps:$4 sm:$0xff]   ;;  %v2327_v38 = vld [vmem:[%s3131_s5 + $0x80] ss:$8 sps:$4 sm:$0xff]  }
  0xec   : > { %v497_v50 = vmax.f32 %v485_v46, 0.0  ;;  %v2332_v39 = vld [vmem:[%s3131_s5 + $0x94] ss:$8 sps:$4 sm:$0xff]   ;;  %v2330_v40 = vld [vmem:[%s3131_s5 + $0x90] ss:$8 sps:$4 sm:$0xff]  }
  0xed   : > { %v498_v48 = vpack.c.bf16 %v489_v42, %v488_v41  ;;  %v2335_v41 = vld [vmem:[%s3131_s5 + $0xa4] ss:$8 sps:$4 sm:$0xff]   ;;  %v2333_v42 = vld [vmem:[%s3131_s5 + $0xa0] ss:$8 sps:$4 sm:$0xff]   ;;  %v2338_v43 = vld [vmem:[%s3131_s5 + $0xb4] ss:$8 sps:$4 sm:$0xff]  }
  0xee   : > { %v457_v49 = vpop.f32.mrb[4].mxu0  ;;  %v2604_v55 = vpack.c.bf16 %v497_v50, %v496_v45  ;;  %v2341_v45 = vld [vmem:[%s3131_s5 + $0xc4] ss:$8 sps:$4 sm:$0xff]   ;;  %v2339_v46 = vld [vmem:[%s3131_s5 + $0xc0] ss:$8 sps:$4 sm:$0xff]  }
  0xef   : > { %v458_v51 = vadd.f32 %v2589_v31, %v457_v49  ;;  %v2163_v52 = vpop.f32.mrb[5].mxu0  ;;  %2003 = vmatmul.mubr.msk.bf16.vlgmr.msra.gmra.mrb[4].mxu1 %vm640_vm3, %v498_v48  ;;  %v2344_v47 = vld [vmem:[%s3131_s5 + $0xd4] ss:$8 sps:$4 sm:$0xff]   ;;  %v2347_v49 = vld [vmem:[%s3131_s5 + $0xe4] ss:$8 sps:$4 sm:$0xff]  }
  0xf0   : > { %2178 = vmatpush3.bf16.msra.mxu1 %v2297_v44  ;;  %v460_v53 = vpop.f32.mrb[6].mxu0  ;;  %698 = vmatprep.mubr.bf16.mxu1 %v2441_v30  ;;  %v2336_v44 = vld [vmem:[%s3131_s5 + $0xb0] ss:$8 sps:$4 sm:$0xff]   ;;  %v2345_v50 = vld [vmem:[%s3131_s5 + $0xe0] ss:$8 sps:$4 sm:$0xff]  }
  0xf1   : > { %v461_v56 = vadd.f32 %v2589_v31, %v460_v53  ;;  %v2164_v57 = vpop.f32.mrb[7].mxu0  ;;  %2179 = vmatprep.subr.bf16.mxu1 %v2439_v0  ;;  %v490_v58 = vmax.f32 %v458_v51, 0.0  ;;  %v2350_v51 = vld [vmem:[%s3131_s5 + $0xf4] ss:$8 sps:$4 sm:$0xff]   ;;  %v2348_v52 = vld [vmem:[%s3131_s5 + $0xf0] ss:$8 sps:$4 sm:$0xff]  }
  0xf2   : > { %v2351_v53 = vld [vmem:[%s3132_s6] sm:$0xff]  }
  0xf3   : > { %v491_v59 = vmax.f32 %v461_v56, 0.0  ;;  %2210 = vmatpush3.bf16.msra.mxu0 %v2351_v53  ;;  %v2354_v56 = vld [vmem:[%s3132_s6 + $0x18] sm:$0xff]   ;;  %v2355_v57 = vld [vmem:[%s3132_s6 + $0x20] sm:$0xff]  }
  0xf4   : > { %2180 = vmatpush3.bf16.msra.mxu1 %v2298_v54  ;;  %2211 = vmatprep.subr.bf16.mxu0 %v2439_v0  ;;  %v2352_v54 = vld [vmem:[%s3132_s6 + $0x8] sm:$0xff]  }
  0xf5   : > { %v499_v61 = vpack.c.bf16 %v491_v59, %v490_v58  ;;  %2181 = vmatprep.subr.bf16.mxu1 %v2439_v0  ;;  %v2356_v58 = vld [vmem:[%s3132_s6 + $0x28] sm:$0xff]   ;;  %v2357_v59 = vld [vmem:[%s3132_s6 + $0x30] sm:$0xff]  }
  0xf6   : > { %v465_v62 = vpop.f32.mrb[8].mxu0 }
  0xf7   : > { %v466_v63 = vadd.f32 %v2589_v31, %v465_v62  ;;  %v2167_v1 = vpop.f32.mrb[9].mxu0  ;;  %2004 = vmatmul.mubr.msk.bf16.gmra.mrb[8].mxu1 %vm640_vm3, %v499_v61  ;;  %2212 = vmatpush3.bf16.msra.mxu0 %v2352_v54 }
  0xf8   : > { %v468_v2 = vpop.f32.mrb[10].mxu0  ;;  %2182 = vmatpush3.bf16.msra.mxu1 %v2299_v60  ;;  %708 = vmatprep.mubr.bf16.mxu1 %v2441_v30  ;;  %v2358_v60 = vld [vmem:[%s3132_s6 + $0x38] sm:$0xff]   ;;  %v2787_v1 = vld [vmem:[%s3130_s4] sm:$0x7] }
  0xf9   : > { %v469_v4 = vadd.f32 %v2589_v31, %v468_v2  ;;  %v2168_v5 = vpop.f32.mrb[11].mxu0  ;;  %2183 = vmatprep.subr.bf16.mxu1 %v2439_v0  ;;  %v492_v6 = vmax.f32 %v466_v63, 0.0  ;;  %2213 = vmatprep.subr.bf16.mxu0 %v2439_v0 }
  0xfb   : > { %v493_v7 = vmax.f32 %v469_v4, 0.0 }
  0xfc   : > { %2184 = vmatpush3.bf16.msra.mxu1 %v2300_v3 }
  0xfd   : > { %v500_v9 = vpack.c.bf16 %v493_v7, %v492_v6  ;;  %2185 = vmatprep.subr.bf16.mxu1 %v2439_v0 }
  0xfe   : > { %v473_v10 = vpop.f32.mrb[12].mxu0 }
  0xff   : > { %v474_v11 = vadd.f32 %v2589_v31, %v473_v10  ;;  %v2171_v12 = vpop.f32.mrb[13].mxu0  ;;  %2005 = vmatmul.mubr.msk.bf16.gmra.mrb[12].mxu1 %vm640_vm3, %v500_v9 }
 0x100   : > { %v476_v13 = vpop.f32.mrb[14].mxu0  ;;  %718 = vmatprep.mubr.bf16.mxu1 %v2441_v30  ;;  %2186 = vmatpush3.bf16.msra.mxu1 %v2301_v8 }
 0x101   : > { %v477_v15 = vadd.f32 %v2589_v31, %v476_v13  ;;  %v2172_v16 = vpop.f32.mrb[15].mxu0  ;;  %2187 = vmatprep.subr.bf16.mxu1 %v2439_v0  ;;  %v494_v18 = vmax.f32 %v474_v11, 0.0  ;;  %v2320_v31 = vld [vmem:[%s3131_s5 + $0x54] ss:$8 sps:$4 sm:$0xff]  }
 0x103   : > { %v495_v19 = vmax.f32 %v477_v15, 0.0 }
 0x104   : > { %2188 = vmatpush3.bf16.msra.mxu1 %v2302_v14 }
 0x105   : > { %v501_v20 = vpack.c.bf16 %v495_v19, %v494_v18  ;;  %1072 = vmatprep.subr.bf16.mxu1 %v2305_v17 }
 0x107   : > { %2006 = vmatmul.mubr.msk.bf16.gmra.mrb[16].mxu1 %vm640_vm3, %v501_v20 }
 0x108   : > { %728 = vmatprep.mubr.bf16.mxu1 %v2441_v30 }
 0x10f   : > { %2007 = vmatmul.mubr.msk.bf16.gmra.mrb[20].mxu1 %vm640_vm3, %v2604_v55 }
 0x110   : > { %2189 = vmatprep.mubr.msk.bf16.mxu1 %vm2440_vm1, %v2439_v0 }
 0x117   : > { %2190 = vmatmul.mubr.msk.bf16.vlgmr.msra.gmra.mrb[24].mxu1 %vm640_vm3, %v498_v48  ;;  %v2342_v48 = vld [vmem:[%s3131_s5 + $0xd0] ss:$8 sps:$4 sm:$0xff]  }
 0x118   : > { %2193 = vmatprep.mubr.msk.bf16.mxu1 %vm2440_vm1, %v2439_v0  ;;  %1073 = vmatpush1.bf16.msra.mxu1 %v2303_v21 }
 0x119   : > { %1074 = vmatprep.subr.bf16.mxu1 %v2308_v22 }
 0x11c   : > { %1075 = vmatpush1.bf16.msra.mxu1 %v2306_v23 }
 0x11d   : > { %1076 = vmatprep.subr.bf16.mxu1 %v2311_v24 }
 0x11f   : > { %2194 = vmatmul.mubr.msk.bf16.gmra.mrb[28].mxu1 %vm640_vm3, %v499_v61  ;;  %v529_v61 = vlaneseq }
 0x120   : > { %2197 = vmatprep.mubr.msk.bf16.mxu1 %vm2440_vm1, %v2439_v0  ;;  %1077 = vmatpush1.bf16.msra.mxu1 %v2309_v25 }
 0x121   : > { %1078 = vmatprep.subr.bf16.mxu1 %v2314_v26  ;;  %v2779_v62 = vshrl.u32 %v529_v61, 7 }
 0x123   : > { %v2782_v63 = vsub.s32 0, %v2779_v62  ;;  %v2790_v2 = vsub.s32 1, %v2779_v62 }
 0x124   : > { %1079 = vmatpush1.bf16.msra.mxu1 %v2312_v27 }
 0x125   : > { %1080 = vmatprep.subr.bf16.mxu1 %v2317_v28  ;;  %v2794_v3 = vrot.slane %v2787_v1, %v2782_v63  ;;  %v2798_v4 = vrot.slane %v2787_v1, %v2790_v2 }
 0x127   : > { %2198 = vmatmul.mubr.msk.bf16.gmra.mrb[32].mxu1 %vm640_vm3, %v500_v9 }
 0x128   : > { %2201 = vmatprep.mubr.msk.bf16.mxu1 %vm2440_vm1, %v2439_v0  ;;  %1081 = vmatpush1.bf16.msra.mxu1 %v2315_v29 }
 0x129   : > { %1082 = vmatprep.subr.bf16.mxu1 %v2320_v31 }
 0x12c   : > { %1083 = vmatpush1.bf16.msra.mxu1 %v2318_v32 }
 0x12d   : > { %1084 = vmatprep.subr.bf16.mxu1 %v2323_v33 }
 0x12f   : > { %2202 = vmatmul.mubr.msk.bf16.gmra.mrb[36].mxu1 %vm640_vm3, %v501_v20 }
 0x130   : > { %2205 = vmatprep.mubr.msk.bf16.mxu1 %vm2440_vm1, %v2439_v0  ;;  %1085 = vmatpush1.bf16.msra.mxu1 %v2321_v34 }
 0x131   : > { %1086 = vmatprep.subr.bf16.mxu1 %v2326_v35 }
 0x134   : > { %1087 = vmatpush1.bf16.msra.mxu1 %v2324_v36 }
 0x135   : > { %1088 = vmatprep.subr.bf16.mxu1 %v2329_v37 }
 0x137   : > { %2206 = vmatmul.mubr.msk.bf16.gmra.mrb[40].mxu1 %vm640_vm3, %v2604_v55  ;;  %v2353_v55 = vld [vmem:[%s3132_s6 + $0x10] sm:$0xff]  }
 0x138   : > { %1089 = vmatpush1.bf16.msra.mxu1 %v2327_v38  ;;  %2214 = vmatpush3.bf16.msra.mxu0 %v2353_v55 }
 0x139   : > { %1090 = vmatprep.subr.bf16.mxu1 %v2332_v39  ;;  %2215 = vmatprep.subr.bf16.mxu0 %v2439_v0 }
 0x13c   : > { %1091 = vmatpush1.bf16.msra.mxu1 %v2330_v40  ;;  %2216 = vmatpush3.bf16.msra.mxu0 %v2354_v56 }
 0x13d   : > { %1092 = vmatprep.subr.bf16.mxu1 %v2335_v41  ;;  %2217 = vmatprep.subr.bf16.mxu0 %v2439_v0 }
 0x140   : > { %1093 = vmatpush1.bf16.msra.mxu1 %v2333_v42  ;;  %2218 = vmatpush3.bf16.msra.mxu0 %v2355_v57 }
 0x141   : > { %1094 = vmatprep.subr.bf16.mxu1 %v2338_v43  ;;  %2219 = vmatprep.subr.bf16.mxu0 %v2439_v0 }
 0x144   : > { %1095 = vmatpush1.bf16.msra.mxu1 %v2336_v44  ;;  %2220 = vmatpush3.bf16.msra.mxu0 %v2356_v58 }
 0x145   : > { %1096 = vmatprep.subr.bf16.mxu1 %v2341_v45  ;;  %2221 = vmatprep.subr.bf16.mxu0 %v2439_v0 }
 0x148   : > { %1097 = vmatpush1.bf16.msra.mxu1 %v2339_v46  ;;  %2222 = vmatpush3.bf16.msra.mxu0 %v2357_v59 }
 0x149   : > { %1098 = vmatprep.subr.bf16.mxu1 %v2344_v47  ;;  %2223 = vmatprep.subr.bf16.mxu0 %v2439_v0 }
 0x14c   : > { %1099 = vmatpush1.bf16.msra.mxu1 %v2342_v48  ;;  %2224 = vmatpush3.bf16.msra.mxu0 %v2358_v60 }
 0x14d   : > { %1100 = vmatprep.subr.bf16.mxu1 %v2347_v49 }
 0x150   : > { %1101 = vmatpush1.bf16.msra.mxu1 %v2345_v50 }
 0x151   : > { %1102 = vmatprep.subr.bf16.mxu1 %v2350_v51 }
 0x154   : > { %1103 = vmatpush1.bf16.msra.mxu1 %v2348_v52 }
 0x1c2   : > { %v690_v5 = vpop.f32.mrb[4].mxu1 }
 0x1c3   : > { %v691_v6 = vadd.f32 %v690_v5, %v2794_v3  ;;  %v692_v7 = vpop.f32.mrb[5].mxu1 }
 0x1c4   : > { %v693_v8 = vadd.f32 %v692_v7, %v2798_v4  ;;  %v694_v9 = vpop.f32.mrb[6].mxu1 }
 0x1c5   : > { %v695_v10 = vadd.f32 %v694_v9, %v2794_v3  ;;  %v696_v11 = vpop.f32.mrb[7].mxu1  ;;  %v812_v13 = vmax.f32 %v691_v6, 0.0 }
 0x1c6   : > { %v697_v12 = vadd.f32 %v696_v11, %v2798_v4  ;;  %v813_v15 = vmax.f32 %v693_v8, 0.0  ;;  %v539_v8 = vsub.s32 2, %v2779_v62 }
 0x1c7   : > { %v815_v14 = vmax.f32 %v695_v10, 0.0 }
 0x1c8   : > { %v816_v16 = vmax.f32 %v697_v12, 0.0 }
 0x1c9   : > { %v891_v17 = vpack.c.bf16 %v815_v14, %v812_v13 }
 0x1ca   : > { %v892_v18 = vpack.c.bf16 %v816_v16, %v813_v15  ;;  %v700_v19 = vpop.f32.mrb[8].mxu1  ;;  %v540_v16 = vrot.slane %v2787_v1, %v539_v8  ;;  %v2364_v8 = vld [vmem:[%s3134_s8 + $0x114] ss:$8 sps:$4 sm:$0xff]  }
 0x1cb   : > { %v701_v20 = vadd.f32 %v700_v19, %v2794_v3  ;;  %v702_v21 = vpop.f32.mrb[9].mxu1 }
 0x1cc   : > { %v703_v22 = vadd.f32 %v702_v21, %v2798_v4  ;;  %v704_v23 = vpop.f32.mrb[10].mxu1  ;;  %1104 = vmatprep.mubr.bf16.mxu1 %v892_v18 }
 0x1cd   : > { %v705_v24 = vadd.f32 %v704_v23, %v2794_v3  ;;  %v706_v25 = vpop.f32.mrb[11].mxu1  ;;  %1105 = vmatmul.mubr.bf16.vlgmr.msra.gmra.mrb[44].mxu1 %v891_v17  ;;  %v818_v27 = vmax.f32 %v701_v20, 0.0 }
 0x1ce   : > { %v707_v26 = vadd.f32 %v706_v25, %v2798_v4  ;;  %v819_v29 = vmax.f32 %v703_v22, 0.0 }
 0x1cf   : > { %v821_v28 = vmax.f32 %v705_v24, 0.0 }
 0x1d0   : > { %v822_v31 = vmax.f32 %v707_v26, 0.0 }
 0x1d1   : > { %v893_v32 = vpack.c.bf16 %v821_v28, %v818_v27 }
 0x1d2   : > { %v894_v33 = vpack.c.bf16 %v822_v31, %v819_v29  ;;  %v710_v34 = vpop.f32.mrb[12].mxu1 }
 0x1d3   : > { %v711_v35 = vadd.f32 %v710_v34, %v2794_v3  ;;  %v712_v36 = vpop.f32.mrb[13].mxu1 }
 0x1d4   : > { %v713_v37 = vadd.f32 %v712_v36, %v2798_v4  ;;  %v714_v38 = vpop.f32.mrb[14].mxu1  ;;  %1114 = vmatprep.mubr.bf16.mxu1 %v894_v33 }
 0x1d5   : > { %v715_v39 = vadd.f32 %v714_v38, %v2794_v3  ;;  %v716_v40 = vpop.f32.mrb[15].mxu1  ;;  %1115 = vmatmul.mubr.bf16.gmra.mrb[48].mxu1 %v893_v32  ;;  %v824_v42 = vmax.f32 %v711_v35, 0.0 }
 0x1d6   : > { %v717_v41 = vadd.f32 %v716_v40, %v2798_v4  ;;  %v825_v44 = vmax.f32 %v713_v37, 0.0 }
 0x1d7   : > { %v827_v43 = vmax.f32 %v715_v39, 0.0 }
 0x1d8   : > { %v828_v45 = vmax.f32 %v717_v41, 0.0 }
 0x1d9   : > { %v895_v46 = vpack.c.bf16 %v827_v43, %v824_v42 }
 0x1da   : > { %v896_v47 = vpack.c.bf16 %v828_v45, %v825_v44  ;;  %v720_v48 = vpop.f32.mrb[16].mxu1 }
 0x1db   : > { %v721_v49 = vadd.f32 %v720_v48, %v2794_v3  ;;  %v722_v50 = vpop.f32.mrb[17].mxu1 }
 0x1dc   : > { %v723_v51 = vadd.f32 %v722_v50, %v2798_v4  ;;  %v724_v52 = vpop.f32.mrb[18].mxu1  ;;  %1124 = vmatprep.mubr.bf16.mxu1 %v896_v47 }
 0x1dd   : > { %v725_v53 = vadd.f32 %v724_v52, %v2794_v3  ;;  %v726_v54 = vpop.f32.mrb[19].mxu1  ;;  %1125 = vmatmul.mubr.bf16.gmra.mrb[52].mxu1 %v895_v46  ;;  %v830_v56 = vmax.f32 %v721_v49, 0.0 }
 0x1de   : > { %v727_v55 = vadd.f32 %v726_v54, %v2798_v4  ;;  %v831_v58 = vmax.f32 %v723_v51, 0.0 }
 0x1df   : > { %v833_v57 = vmax.f32 %v725_v53, 0.0 }
 0x1e0   : > { %v834_v59 = vmax.f32 %v727_v55, 0.0 }
 0x1e1   : > { %v897_v60 = vpack.c.bf16 %v833_v57, %v830_v56 }
 0x1e2   : > { %v898_v61 = vpack.c.bf16 %v834_v59, %v831_v58  ;;  %v730_v5 = vpop.f32.mrb[20].mxu1 }
 0x1e3   : > { %v731_v6 = vadd.f32 %v730_v5, %v2794_v3  ;;  %v732_v7 = vpop.f32.mrb[21].mxu1 }
 0x1e4   : > { %v733_v9 = vadd.f32 %v732_v7, %v2798_v4  ;;  %v734_v10 = vpop.f32.mrb[22].mxu1  ;;  %1134 = vmatprep.mubr.bf16.mxu1 %v898_v61  ;;  %v2361_v7 = vld [vmem:[%s3134_s8 + $0x104] ss:$8 sps:$4 sm:$0xff]  }
 0x1e5   : > { %v735_v11 = vadd.f32 %v734_v10, %v2794_v3  ;;  %v736_v12 = vpop.f32.mrb[23].mxu1  ;;  %1135 = vmatmul.mubr.bf16.gmra.mrb[56].mxu1 %v897_v60  ;;  %v836_v14 = vmax.f32 %v731_v6, 0.0  ;;  %v2359_v6 = vld [vmem:[%s3134_s8 + $0x100] ss:$8 sps:$4 sm:$0xff]   ;;  %1461 = vmatprep.subr.bf16.mxu0 %v2361_v7  ;;  %v2367_v10 = vld [vmem:[%s3134_s8 + $0x124] ss:$8 sps:$4 sm:$0xff]  }
 0x1e6   : > { %v737_v13 = vadd.f32 %v736_v12, %v2798_v4  ;;  %v837_v17 = vmax.f32 %v733_v9, 0.0  ;;  %v2365_v9 = vld [vmem:[%s3134_s8 + $0x120] ss:$8 sps:$4 sm:$0xff]   ;;  %v2370_v12 = vld [vmem:[%s3134_s8 + $0x134] ss:$8 sps:$4 sm:$0xff]  }
 0x1e7   : > { %v839_v15 = vmax.f32 %v735_v11, 0.0  ;;  %v2368_v11 = vld [vmem:[%s3134_s8 + $0x130] ss:$8 sps:$4 sm:$0xff]  }
 0x1e8   : > { %v840_v18 = vmax.f32 %v737_v13, 0.0  ;;  %v2373_v13 = vld [vmem:[%s3134_s8 + $0x144] ss:$8 sps:$4 sm:$0xff]  }
 0x1e9   : > { %v899_v19 = vpack.c.bf16 %v839_v15, %v836_v14  ;;  %v2371_v14 = vld [vmem:[%s3134_s8 + $0x140] ss:$8 sps:$4 sm:$0xff]   ;;  %v2374_v15 = vld [vmem:[%s3134_s8 + $0x150] ss:$8 sps:$4 sm:$0xff]  }
 0x1ea   : > { %v900_v20 = vpack.c.bf16 %v840_v18, %v837_v17  ;;  %v773_v21 = vpop.f32.mrb[24].mxu1  ;;  %v2379_v17 = vld [vmem:[%s3134_s8 + $0x164] ss:$8 sps:$4 sm:$0xff]   ;;  %v2377_v18 = vld [vmem:[%s3134_s8 + $0x160] ss:$8 sps:$4 sm:$0xff]  }
 0x1eb   : > { %v774_v62 = vadd.f32 %v773_v21, %v540_v16  ;;  %v2191_v22 = vpop.f32.mrb[25].mxu1  ;;  %v2385_v21 = vld [vmem:[%s3134_s8 + $0x4] ss:$8 sps:$4 sm:$0xff]  }
 0x1ec   : > { %v776_v23 = vpop.f32.mrb[26].mxu1  ;;  %1144 = vmatprep.mubr.bf16.mxu1 %v900_v20  ;;  %v2380_v20 = vld [vmem:[%s3134_s8 + $0x170] ss:$8 sps:$4 sm:$0xff]  }
 0x1ed   : > { %v777_v24 = vadd.f32 %v776_v23, %v540_v16  ;;  %v2192_v25 = vpop.f32.mrb[27].mxu1  ;;  %1145 = vmatmul.mubr.bf16.gmra.mrb[60].mxu1 %v899_v19  ;;  %v814_v3 = vmax.f32 %v774_v62, 0.0  ;;  %v2382_v19 = vld [vmem:[%s3134_s8 + $0x174] ss:$8 sps:$4 sm:$0xff]   ;;  %v890_v62 = vld [vmem:[%s3133_s7] sm:$0x3] }
 0x1ee   : > { %v2886_v22 = vrot.slane %v890_v62, %v2782_v63  ;;  %v2889_v23 = vrot.slane %v890_v62, %v2790_v2 }
 0x1ef   : > { %v817_v26 = vmax.f32 %v777_v24, 0.0 }
 0x1f1   : > { %v1176_v27 = vpack.c.bf16 %v817_v26, %v814_v3 }
 0x1f2   : > { %v781_v4 = vpop.f32.mrb[28].mxu1 }
 0x1f3   : > { %v782_v28 = vadd.f32 %v781_v4, %v540_v16  ;;  %v2195_v29 = vpop.f32.mrb[29].mxu1  ;;  %2226 = vmatmul.mubr.bf16.vlgmr.msra.gmra.mrb[16].mxu0 %v1176_v27 }
 0x1f4   : > { %v784_v1 = vpop.f32.mrb[30].mxu1  ;;  %2229 = vmatprep.mubr.msk.bf16.mxu0 %vm2440_vm1, %v2439_v0  ;;  %1462 = vmatpush1.bf16.msra.mxu0 %v2359_v6 }
 0x1f5   : > { %v785_v31 = vadd.f32 %v784_v1, %v540_v16  ;;  %v2196_v32 = vpop.f32.mrb[31].mxu1  ;;  %v820_v33 = vmax.f32 %v782_v28, 0.0  ;;  %1463 = vmatprep.subr.bf16.mxu0 %v2364_v8 }
 0x1f7   : > { %v823_v34 = vmax.f32 %v785_v31, 0.0 }
 0x1f9   : > { %v1177_v35 = vpack.c.bf16 %v823_v34, %v820_v33 }
 0x1fa   : > { %v789_v36 = vpop.f32.mrb[32].mxu1 }
 0x1fb   : > { %v790_v37 = vadd.f32 %v789_v36, %v540_v16  ;;  %v2199_v38 = vpop.f32.mrb[33].mxu1  ;;  %2230 = vmatmul.mubr.bf16.gmra.mrb[20].mxu0 %v1177_v35 }
 0x1fc   : > { %v792_v39 = vpop.f32.mrb[34].mxu1  ;;  %2233 = vmatprep.mubr.msk.bf16.mxu0 %vm2440_vm1, %v2439_v0 }
 0x1fd   : > { %v793_v40 = vadd.f32 %v792_v39, %v540_v16  ;;  %v2200_v41 = vpop.f32.mrb[35].mxu1  ;;  %v826_v42 = vmax.f32 %v790_v37, 0.0 }
 0x1ff   : > { %v829_v43 = vmax.f32 %v793_v40, 0.0 }
 0x201   : > { %v1178_v44 = vpack.c.bf16 %v829_v43, %v826_v42 }
 0x202   : > { %v797_v45 = vpop.f32.mrb[36].mxu1 }
 0x203   : > { %v798_v46 = vadd.f32 %v797_v45, %v540_v16  ;;  %v2203_v47 = vpop.f32.mrb[37].mxu1  ;;  %2234 = vmatmul.mubr.bf16.gmra.mrb[24].mxu0 %v1178_v44 }
 0x204   : > { %v800_v48 = vpop.f32.mrb[38].mxu1  ;;  %2237 = vmatprep.mubr.msk.bf16.mxu0 %vm2440_vm1, %v2439_v0 }
 0x205   : > { %v801_v49 = vadd.f32 %v800_v48, %v540_v16  ;;  %v2204_v50 = vpop.f32.mrb[39].mxu1  ;;  %v832_v51 = vmax.f32 %v798_v46, 0.0 }
 0x207   : > { %v835_v52 = vmax.f32 %v801_v49, 0.0 }
 0x209   : > { %v1179_v53 = vpack.c.bf16 %v835_v52, %v832_v51 }
 0x20a   : > { %v805_v54 = vpop.f32.mrb[40].mxu1 }
 0x20b   : > { %v806_v55 = vadd.f32 %v805_v54, %v540_v16  ;;  %v2207_v56 = vpop.f32.mrb[41].mxu1  ;;  %2238 = vmatmul.mubr.bf16.gmra.mrb[28].mxu0 %v1179_v53 }
 0x20c   : > { %v808_v57 = vpop.f32.mrb[42].mxu1  ;;  %2241 = vmatprep.mubr.msk.bf16.mxu0 %vm2440_vm1, %v2439_v0  ;;  %v2362_v0 = vld [vmem:[%s3134_s8 + $0x110] ss:$8 sps:$4 sm:$0xff]  }
 0x20d   : > { %v809_v58 = vadd.f32 %v808_v57, %v540_v16  ;;  %v2208_v59 = vpop.f32.mrb[43].mxu1  ;;  %v838_v60 = vmax.f32 %v806_v55, 0.0  ;;  %1464 = vmatpush1.bf16.msra.mxu0 %v2362_v0  ;;  %v2376_v16 = vld [vmem:[%s3134_s8 + $0x154] ss:$8 sps:$4 sm:$0xff]  }
 0x20e   : > { %1465 = vmatprep.subr.bf16.mxu0 %v2367_v10 }
 0x20f   : > { %v841_v61 = vmax.f32 %v809_v58, 0.0 }
 0x211   : > { %v1180_v5 = vpack.c.bf16 %v841_v61, %v838_v60  ;;  %1466 = vmatpush1.bf16.msra.mxu0 %v2365_v9 }
 0x212   : > { %1467 = vmatprep.subr.bf16.mxu0 %v2370_v12 }
 0x213   : > { %2242 = vmatmul.mubr.bf16.gmra.mrb[32].mxu0 %v1180_v5 }
 0x214   : > { %1493 = vmatprep.mubr.bf16.mxu0 %v2441_v30 }
 0x215   : > { %1468 = vmatpush1.bf16.msra.mxu0 %v2368_v11 }
 0x216   : > { %1469 = vmatprep.subr.bf16.mxu0 %v2373_v13 }
 0x219   : > { %1470 = vmatpush1.bf16.msra.mxu0 %v2371_v14 }
 0x21a   : > { %1471 = vmatprep.subr.bf16.mxu0 %v2376_v16 }
 0x21d   : > { %1472 = vmatpush1.bf16.msra.mxu0 %v2374_v15 }
 0x21e   : > { %1473 = vmatprep.subr.bf16.mxu0 %v2379_v17 }
 0x221   : > { %1474 = vmatpush1.bf16.msra.mxu0 %v2377_v18 }
 0x222   : > { %1475 = vmatprep.subr.bf16.mxu0 %v2382_v19 }
 0x225   : > { %1476 = vmatpush1.bf16.msra.mxu0 %v2380_v20 }
 0x226   : > { %1704 = vmatprep.subr.bf16.mxu0 %v2385_v21 }
 0x2a0   : > { %v1106_v24 = vpop.f32.mrb[44].mxu1 }
 0x2a1   : > { %v1107_v25 = vadd.f32 %v1106_v24, %v2886_v22  ;;  %v1108_v3 = vpop.f32.mrb[45].mxu1 }
 0x2a2   : > { %v1109_v26 = vadd.f32 %v1108_v3, %v2889_v23  ;;  %v1110_v27 = vpop.f32.mrb[46].mxu1 }
 0x2a3   : > { %v1111_v4 = vadd.f32 %v1110_v27, %v2886_v22  ;;  %v1112_v28 = vpop.f32.mrb[47].mxu1  ;;  %v1155_v1 = vmax.f32 %v1107_v25, 0.0 }
 0x2a4   : > { %v1113_v29 = vadd.f32 %v1112_v28, %v2889_v23  ;;  %v1156_v32 = vmax.f32 %v1109_v26, 0.0 }
 0x2a5   : > { %v1157_v31 = vmax.f32 %v1111_v4, 0.0  ;;  %v2930_v4 = vld [vmem:[%s3133_s7 + $0x2] ss:$0 sm:$0xff] }
 0x2a6   : > { %v1158_v33 = vmax.f32 %v1113_v29, 0.0 }
 0x2a7   : > { %v2895_v34 = vpack.c.bf16 %v1157_v31, %v1155_v1 }
 0x2a8   : > { %v2897_v35 = vpack.c.bf16 %v1158_v33, %v1156_v32  ;;  %v1116_v36 = vpop.f32.mrb[48].mxu1 }
 0x2a9   : > { %v1117_v37 = vadd.f32 %v1116_v36, %v2886_v22  ;;  %v1118_v38 = vpop.f32.mrb[49].mxu1 }
 0x2aa   : > { %v1119_v39 = vadd.f32 %v1118_v38, %v2889_v23  ;;  %v1120_v40 = vpop.f32.mrb[50].mxu1 }
 0x2ab   : > { %v1121_v41 = vadd.f32 %v1120_v40, %v2886_v22  ;;  %v1122_v42 = vpop.f32.mrb[51].mxu1  ;;  %v1159_v44 = vmax.f32 %v1117_v37, 0.0 }
 0x2ac   : > { %v1123_v43 = vadd.f32 %v1122_v42, %v2889_v23  ;;  %v1160_v46 = vmax.f32 %v1119_v39, 0.0  ;;  %v2383_v42 = vld [vmem:[%s3134_s8] ss:$8 sps:$4 sm:$0xff]  }
 0x2ad   : > { %v1161_v45 = vmax.f32 %v1121_v41, 0.0 }
 0x2ae   : > { %v1162_v47 = vmax.f32 %v1123_v43, 0.0 }
 0x2af   : > { %v2903_v48 = vpack.c.bf16 %v1161_v45, %v1159_v44  ;;  %v2388_v44 = vld [vmem:[%s3134_s8 + $0x14] ss:$8 sps:$4 sm:$0xff]  }
 0x2b0   : > { %v2905_v49 = vpack.c.bf16 %v1162_v47, %v1160_v46  ;;  %v1126_v50 = vpop.f32.mrb[52].mxu1 }
 0x2b1   : > { %v1127_v51 = vadd.f32 %v1126_v50, %v2886_v22  ;;  %v1128_v52 = vpop.f32.mrb[53].mxu1 }
 0x2b2   : > { %v1129_v53 = vadd.f32 %v1128_v52, %v2889_v23  ;;  %v1130_v54 = vpop.f32.mrb[54].mxu1 }
 0x2b3   : > { %v1131_v55 = vadd.f32 %v1130_v54, %v2886_v22  ;;  %v1132_v56 = vpop.f32.mrb[55].mxu1  ;;  %v1163_v58 = vmax.f32 %v1127_v51, 0.0  ;;  %v2386_v51 = vld [vmem:[%s3134_s8 + $0x10] ss:$8 sps:$4 sm:$0xff]   ;;  %v2391_v54 = vld [vmem:[%s3134_s8 + $0x24] ss:$8 sps:$4 sm:$0xff]  }
 0x2b4   : > { %v1133_v57 = vadd.f32 %v1132_v56, %v2889_v23  ;;  %v1164_v60 = vmax.f32 %v1129_v53, 0.0 }
 0x2b5   : > { %v1165_v59 = vmax.f32 %v1131_v55, 0.0 }
 0x2b6   : > { %v1166_v61 = vmax.f32 %v1133_v57, 0.0  ;;  %v2389_v57 = vld [vmem:[%s3134_s8 + $0x20] ss:$8 sps:$4 sm:$0xff]  }
 0x2b7   : > { %v2911_v5 = vpack.c.bf16 %v1165_v59, %v1163_v58  ;;  %v2394_v59 = vld [vmem:[%s3134_s8 + $0x34] ss:$8 sps:$4 sm:$0xff]  }
 0x2b8   : > { %v2913_v6 = vpack.c.bf16 %v1166_v61, %v1164_v60  ;;  %v1136_v7 = vpop.f32.mrb[56].mxu1 }
 0x2b9   : > { %v1137_v0 = vadd.f32 %v1136_v7, %v2886_v22  ;;  %v1138_v8 = vpop.f32.mrb[57].mxu1 }
 0x2ba   : > { %v1139_v9 = vadd.f32 %v1138_v8, %v2889_v23  ;;  %v1140_v10 = vpop.f32.mrb[58].mxu1  ;;  %v2392_v8 = vld [vmem:[%s3134_s8 + $0x30] ss:$8 sps:$4 sm:$0xff]  }
 0x2bb   : > { %v1141_v11 = vadd.f32 %v1140_v10, %v2886_v22  ;;  %v1142_v12 = vpop.f32.mrb[59].mxu1  ;;  %v1167_v14 = vmax.f32 %v1137_v0, 0.0 }
 0x2bc   : > { %v1143_v13 = vadd.f32 %v1142_v12, %v2889_v23  ;;  %v1168_v16 = vmax.f32 %v1139_v9, 0.0 }
 0x2bd   : > { %v1169_v15 = vmax.f32 %v1141_v11, 0.0  ;;  %v2397_v11 = vld [vmem:[%s3134_s8 + $0x44] ss:$8 sps:$4 sm:$0xff]  }
 0x2be   : > { %v1170_v17 = vmax.f32 %v1143_v13, 0.0 }
 0x2bf   : > { %v2919_v18 = vpack.c.bf16 %v1169_v15, %v1167_v14  ;;  %v2395_v14 = vld [vmem:[%s3134_s8 + $0x40] ss:$8 sps:$4 sm:$0xff]  }
 0x2c0   : > { %v2921_v19 = vpack.c.bf16 %v1170_v17, %v1168_v16  ;;  %v1146_v20 = vpop.f32.mrb[60].mxu1  ;;  %v2400_v16 = vld [vmem:[%s3134_s8 + $0x54] ss:$8 sps:$4 sm:$0xff]  }
 0x2c1   : > { %v1147_v21 = vadd.f32 %v1146_v20, %v2886_v22  ;;  %v1148_v62 = vpop.f32.mrb[61].mxu1 }
 0x2c2   : > { %v1149_v24 = vadd.f32 %v1148_v62, %v2889_v23  ;;  %v1150_v25 = vpop.f32.mrb[62].mxu1 }
 0x2c3   : > { %v1151_v3 = vadd.f32 %v1150_v25, %v2886_v22  ;;  %v1152_v26 = vpop.f32.mrb[63].mxu1  ;;  %v1171_v28 = vmax.f32 %v1147_v21, 0.0 }
 0x2c4   : > { %v1153_v27 = vadd.f32 %v1152_v26, %v2889_v23  ;;  %v1172_v1 = vmax.f32 %v1149_v24, 0.0  ;;  %v2398_v24 = vld [vmem:[%s3134_s8 + $0x50] ss:$8 sps:$4 sm:$0xff]   ;;  %v2403_v26 = vld [vmem:[%s3134_s8 + $0x64] ss:$8 sps:$4 sm:$0xff]  }
 0x2c5   : > { %v1173_v29 = vmax.f32 %v1151_v3, 0.0 }
 0x2c6   : > { %v1174_v31 = vmax.f32 %v1153_v27, 0.0  ;;  %v1269_v32 = vpop.f32.mrb[16].mxu0 }
 0x2c7   : > { %v2932_v33 = vpack.c.bf16 %v1173_v29, %v1171_v28  ;;  %v1270_v36 = vadd.f32 %v2930_v4, %v1269_v32  ;;  %v2227_v37 = vpop.f32.mrb[17].mxu0  ;;  %v2401_v29 = vld [vmem:[%s3134_s8 + $0x60] ss:$8 sps:$4 sm:$0xff]  }
 0x2c8   : > { %v2935_v38 = vpack.c.bf16 %v1174_v31, %v1172_v1  ;;  %v1272_v22 = vpop.f32.mrb[18].mxu0  ;;  %v2406_v31 = vld [vmem:[%s3134_s8 + $0x74] ss:$8 sps:$4 sm:$0xff]  }
 0x2c9   : > { %v1273_v23 = vadd.f32 %v2930_v4, %v1272_v22  ;;  %v2228_v39 = vpop.f32.mrb[19].mxu0  ;;  %v1308_v40 = vmax.f32 %v1270_v36, 0.0 }
 0x2cb   : > { %v1309_v41 = vmax.f32 %v1273_v23, 0.0  ;;  %v2404_v23 = vld [vmem:[%s3134_s8 + $0x70] ss:$8 sps:$4 sm:$0xff]  }
 0x2cd   : > { %v1376_v43 = vpack.c.bf16 %v1309_v41, %v1308_v40  ;;  %v2409_v41 = vld [vmem:[%s3134_s8 + $0x84] ss:$8 sps:$4 sm:$0xff]  }
 0x2ce   : > { %v1277_v45 = vpop.f32.mrb[20].mxu0 }
 0x2cf   : > { %v1278_v46 = vadd.f32 %v2930_v4, %v1277_v45  ;;  %v2231_v47 = vpop.f32.mrb[21].mxu0  ;;  %1494 = vmatmul.mubr.bf16.vlgmr.msra.gmra.mrb[36].mxu0 %v1376_v43 }
 0x2d0   : > { %1705 = vmatpush1.bf16.msra.mxu0 %v2383_v42  ;;  %v1280_v50 = vpop.f32.mrb[22].mxu0  ;;  %1503 = vmatprep.mubr.bf16.mxu0 %v2441_v30  ;;  %v2413_v47 = vld [vmem:[%s3134_s8 + $0xa0] ss:$8 sps:$4 sm:$0xff]  }
 0x2d1   : > { %v1281_v52 = vadd.f32 %v2930_v4, %v1280_v50  ;;  %v2232_v53 = vpop.f32.mrb[23].mxu0  ;;  %1706 = vmatprep.subr.bf16.mxu0 %v2388_v44  ;;  %v1310_v55 = vmax.f32 %v1278_v46, 0.0  ;;  %v2407_v44 = vld [vmem:[%s3134_s8 + $0x80] ss:$8 sps:$4 sm:$0xff]   ;;  %v2415_v46 = vld [vmem:[%s3134_s8 + $0xa4] ss:$8 sps:$4 sm:$0xff]  }
 0x2d2   : > { %v2418_v50 = vld [vmem:[%s3134_s8 + $0xb4] ss:$8 sps:$4 sm:$0xff]  }
 0x2d3   : > { %v1311_v56 = vmax.f32 %v1281_v52, 0.0  ;;  %v2419_v52 = vld [vmem:[%s3134_s8 + $0xc0] ss:$8 sps:$4 sm:$0xff]   ;;  %v2424_v53 = vld [vmem:[%s3134_s8 + $0xd4] ss:$8 sps:$4 sm:$0xff]  }
 0x2d4   : > { %1707 = vmatpush1.bf16.msra.mxu0 %v2386_v51  ;;  %v2421_v51 = vld [vmem:[%s3134_s8 + $0xc4] ss:$8 sps:$4 sm:$0xff]  }
 0x2d5   : > { %v1377_v58 = vpack.c.bf16 %v1311_v56, %v1310_v55  ;;  %1708 = vmatprep.subr.bf16.mxu0 %v2391_v54  ;;  %v2422_v54 = vld [vmem:[%s3134_s8 + $0xd0] ss:$8 sps:$4 sm:$0xff]   ;;  %v2427_v55 = vld [vmem:[%s3134_s8 + $0xe4] ss:$8 sps:$4 sm:$0xff]   ;;  %v2425_v56 = vld [vmem:[%s3134_s8 + $0xe0] ss:$8 sps:$4 sm:$0xff]  }
 0x2d6   : > { %v1285_v60 = vpop.f32.mrb[24].mxu0 }
 0x2d7   : > { %v1286_v61 = vadd.f32 %v2930_v4, %v1285_v60  ;;  %v2235_v7 = vpop.f32.mrb[25].mxu0  ;;  %1504 = vmatmul.mubr.bf16.gmra.mrb[40].mxu0 %v1377_v58  ;;  %v2428_v58 = vld [vmem:[%s3134_s8 + $0xf0] ss:$8 sps:$4 sm:$0xff]  }
 0x2d8   : > { %1709 = vmatpush1.bf16.msra.mxu0 %v2389_v57  ;;  %v1288_v0 = vpop.f32.mrb[26].mxu0  ;;  %1513 = vmatprep.mubr.bf16.mxu0 %v2441_v30  ;;  %v2430_v57 = vld [vmem:[%s3134_s8 + $0xf4] ss:$8 sps:$4 sm:$0xff]  }
 0x2d9   : > { %v1289_v9 = vadd.f32 %v2930_v4, %v1288_v0  ;;  %v2236_v10 = vpop.f32.mrb[27].mxu0  ;;  %1710 = vmatprep.subr.bf16.mxu0 %v2394_v59  ;;  %v1312_v12 = vmax.f32 %v1286_v61, 0.0 }
 0x2db   : > { %v1313_v13 = vmax.f32 %v1289_v9, 0.0 }
 0x2dc   : > { %1711 = vmatpush1.bf16.msra.mxu0 %v2392_v8 }
 0x2dd   : > { %v1378_v15 = vpack.c.bf16 %v1313_v13, %v1312_v12  ;;  %1712 = vmatprep.subr.bf16.mxu0 %v2397_v11 }
 0x2de   : > { %v1293_v17 = vpop.f32.mrb[28].mxu0 }
 0x2df   : > { %v1294_v20 = vadd.f32 %v2930_v4, %v1293_v17  ;;  %v2239_v21 = vpop.f32.mrb[29].mxu0  ;;  %1514 = vmatmul.mubr.bf16.gmra.mrb[44].mxu0 %v1378_v15 }
 0x2e0   : > { %1713 = vmatpush1.bf16.msra.mxu0 %v2395_v14  ;;  %v1296_v62 = vpop.f32.mrb[30].mxu0  ;;  %1523 = vmatprep.mubr.bf16.mxu0 %v2441_v30 }
 0x2e1   : > { %v1297_v25 = vadd.f32 %v2930_v4, %v1296_v62  ;;  %v2240_v3 = vpop.f32.mrb[31].mxu0  ;;  %1714 = vmatprep.subr.bf16.mxu0 %v2400_v16  ;;  %v1314_v27 = vmax.f32 %v1294_v20, 0.0 }
 0x2e3   : > { %v1315_v28 = vmax.f32 %v1297_v25, 0.0 }
 0x2e4   : > { %1715 = vmatpush1.bf16.msra.mxu0 %v2398_v24 }
 0x2e5   : > { %v1379_v1 = vpack.c.bf16 %v1315_v28, %v1314_v27  ;;  %1716 = vmatprep.subr.bf16.mxu0 %v2403_v26 }
 0x2e6   : > { %v1301_v32 = vpop.f32.mrb[32].mxu0 }
 0x2e7   : > { %v1302_v36 = vadd.f32 %v2930_v4, %v1301_v32  ;;  %v2243_v37 = vpop.f32.mrb[33].mxu0  ;;  %1524 = vmatmul.mubr.bf16.gmra.mrb[48].mxu0 %v1379_v1 }
 0x2e8   : > { %1717 = vmatpush1.bf16.msra.mxu0 %v2401_v29  ;;  %v1304_v22 = vpop.f32.mrb[34].mxu0  ;;  %1533 = vmatprep.mubr.bf16.mxu0 %v2441_v30  ;;  %v2412_v30 = vld [vmem:[%s3134_s8 + $0x94] ss:$8 sps:$4 sm:$0xff]  }
 0x2e9   : > { %v1305_v39 = vadd.f32 %v2930_v4, %v1304_v22  ;;  %v2244_v40 = vpop.f32.mrb[35].mxu0  ;;  %1718 = vmatprep.subr.bf16.mxu0 %v2406_v31  ;;  %v1316_v42 = vmax.f32 %v1302_v36, 0.0  ;;  %v2410_v4 = vld [vmem:[%s3134_s8 + $0x90] ss:$8 sps:$4 sm:$0xff]  }
 0x2eb   : > { %v1317_v43 = vmax.f32 %v1305_v39, 0.0 }
 0x2ec   : > { %1719 = vmatpush1.bf16.msra.mxu0 %v2404_v23 }
 0x2ed   : > { %v1380_v45 = vpack.c.bf16 %v1317_v43, %v1316_v42  ;;  %1720 = vmatprep.subr.bf16.mxu0 %v2409_v41 }
 0x2ef   : > { %1534 = vmatmul.mubr.bf16.gmra.mrb[52].mxu0 %v1380_v45 }
 0x2f0   : > { %1721 = vmatpush1.bf16.msra.mxu0 %v2407_v44  ;;  %1736 = vmatprep.mubr.bf16.mxu0 %v2897_v35  ;;  %v2416_v35 = vld [vmem:[%s3134_s8 + $0xb0] ss:$8 sps:$4 sm:$0xff]  }
 0x2f1   : > { %1722 = vmatprep.subr.bf16.mxu0 %v2412_v30 }
 0x2f4   : > { %1723 = vmatpush1.bf16.msra.mxu0 %v2410_v4 }
 0x2f5   : > { %1724 = vmatprep.subr.bf16.mxu0 %v2415_v46 }
 0x2f8   : > { %1725 = vmatpush1.bf16.msra.mxu0 %v2413_v47 }
 0x2f9   : > { %1726 = vmatprep.subr.bf16.mxu0 %v2418_v50 }
 0x2fc   : > { %1727 = vmatpush1.bf16.msra.mxu0 %v2416_v35 }
 0x2fd   : > { %1728 = vmatprep.subr.bf16.mxu0 %v2421_v51 }
 0x300   : > { %1729 = vmatpush1.bf16.msra.mxu0 %v2419_v52 }
 0x301   : > { %1730 = vmatprep.subr.bf16.mxu0 %v2424_v53 }
 0x304   : > { %1731 = vmatpush1.bf16.msra.mxu0 %v2422_v54 }
 0x305   : > { %1732 = vmatprep.subr.bf16.mxu0 %v2427_v55 }
 0x308   : > { %1733 = vmatpush1.bf16.msra.mxu0 %v2425_v56 }
 0x309   : > { %1734 = vmatprep.subr.bf16.mxu0 %v2430_v57 }
 0x30c   : > { %1735 = vmatpush1.bf16.msra.mxu0 %v2428_v58 }
 0x30f   : > { %1737 = vmatmul.mubr.bf16.vlgmr.msra.gmra.mrb[36].mxu0 %v2895_v34  ;;  %v1787_v34 = vld [vmem:[%s3135_s9] sm:$0x3] }
 0x310   : > { %1746 = vmatprep.mubr.bf16.mxu0 %v2905_v49  ;;  %v3057_v49 = vrot.slane %v1787_v34, %v2782_v63 }
 0x317   : > { %1747 = vmatmul.mubr.bf16.gmra.mrb[40].mxu0 %v2903_v48  ;;  %v3060_v48 = vrot.slane %v1787_v34, %v2790_v2 }
 0x318   : > { %1756 = vmatprep.mubr.bf16.mxu0 %v2913_v6 }
 0x31f   : > { %1757 = vmatmul.mubr.bf16.gmra.mrb[44].mxu0 %v2911_v5 }
 0x320   : > { %1766 = vmatprep.mubr.bf16.mxu0 %v2921_v19 }
 0x327   : > { %1767 = vmatmul.mubr.bf16.gmra.mrb[48].mxu0 %v2919_v18 }
 0x328   : > { %1776 = vmatprep.mubr.bf16.mxu0 %v2935_v38 }
 0x32f   : > { %1777 = vmatmul.mubr.bf16.gmra.mrb[52].mxu0 %v2932_v33 }
 0x3e2   : > { %v1738_v5 = vpop.f32.mrb[36].mxu0 }
 0x3e3   : > { %v1799_v6 = vadd.f32 %v3057_v49, %v1738_v5  ;;  %v1740_v19 = vpop.f32.mrb[37].mxu0 }
 0x3e4   : > { %v1800_v18 = vadd.f32 %v3060_v48, %v1740_v19  ;;  %v1742_v33 = vpop.f32.mrb[38].mxu0 }
 0x3e5   : > { %v1819_v38 = vmax.f32 %v1799_v6, 0.0  ;;  %v1801_v59 = vadd.f32 %v3057_v49, %v1742_v33  ;;  %v1744_v60 = vpop.f32.mrb[39].mxu0 }
 0x3e6   : > { %v1820_v61 = vmax.f32 %v1800_v18, 0.0  ;;  %v1802_v63 = vadd.f32 %v3060_v48, %v1744_v60 }
 0x3e7   : > { %v1821_v7 = vmax.f32 %v1801_v59, 0.0 }
 0x3e8   : > { %v2115_v0 = vpack.c.bf16 %v1820_v61, %v1819_v38  ;;  %v1822_v8 = vmax.f32 %v1802_v63, 0.0 }
 0x3ea   : > { %1902 = vst.msk [vmem:[%s3071_s23] sm:$0xff] %vm3073_vm6, %v2115_v0  ;;  %v2116_v9 = vpack.c.bf16 %v1822_v8, %v1821_v7  ;;  %v1748_v10 = vpop.f32.mrb[40].mxu0 }
 0x3eb   : > { %v1803_v11 = vadd.f32 %v3057_v49, %v1748_v10  ;;  %v1750_v12 = vpop.f32.mrb[41].mxu0 }
 0x3ec   : > { %1903 = vst.msk [vmem:[%s3071_s23 + $0x8] sm:$0xff] %vm3073_vm6, %v2116_v9  ;;  %v1804_v13 = vadd.f32 %v3060_v48, %v1750_v12  ;;  %v1752_v14 = vpop.f32.mrb[42].mxu0 }
 0x3ed   : > { %v1823_v15 = vmax.f32 %v1803_v11, 0.0  ;;  %v1805_v16 = vadd.f32 %v3057_v49, %v1752_v14  ;;  %v1754_v17 = vpop.f32.mrb[43].mxu0 }
 0x3ee   : > { %v1824_v20 = vmax.f32 %v1804_v13, 0.0  ;;  %v1806_v21 = vadd.f32 %v3060_v48, %v1754_v17 }
 0x3ef   : > { %v1825_v62 = vmax.f32 %v1805_v16, 0.0 }
 0x3f0   : > { %v2117_v24 = vpack.c.bf16 %v1824_v20, %v1823_v15  ;;  %v1826_v25 = vmax.f32 %v1806_v21, 0.0 }
 0x3f2   : > { %1904 = vst.msk [vmem:[%s3071_s23 + $0x10] sm:$0xff] %vm3073_vm6, %v2117_v24  ;;  %v2118_v3 = vpack.c.bf16 %v1826_v25, %v1825_v62  ;;  %v1758_v26 = vpop.f32.mrb[44].mxu0 }
 0x3f3   : > { %v1807_v27 = vadd.f32 %v3057_v49, %v1758_v26  ;;  %v1760_v28 = vpop.f32.mrb[45].mxu0 }
 0x3f4   : > { %1905 = vst.msk [vmem:[%s3071_s23 + $0x18] sm:$0xff] %vm3073_vm6, %v2118_v3  ;;  %v1808_v29 = vadd.f32 %v3060_v48, %v1760_v28  ;;  %v1762_v1 = vpop.f32.mrb[46].mxu0 }
 0x3f5   : > { %v1827_v31 = vmax.f32 %v1807_v27, 0.0  ;;  %v1809_v32 = vadd.f32 %v3057_v49, %v1762_v1  ;;  %v1764_v36 = vpop.f32.mrb[47].mxu0 }
 0x3f6   : > { %v1828_v37 = vmax.f32 %v1808_v29, 0.0  ;;  %v1810_v22 = vadd.f32 %v3060_v48, %v1764_v36 }
 0x3f7   : > { %v1829_v23 = vmax.f32 %v1809_v32, 0.0 }
 0x3f8   : > { %v2119_v39 = vpack.c.bf16 %v1828_v37, %v1827_v31  ;;  %v1830_v40 = vmax.f32 %v1810_v22, 0.0 }
 0x3fa   : > { %1906 = vst.msk [vmem:[%s3071_s23 + $0x20] sm:$0xff] %vm3073_vm6, %v2119_v39  ;;  %v2120_v41 = vpack.c.bf16 %v1830_v40, %v1829_v23  ;;  %v1768_v42 = vpop.f32.mrb[48].mxu0 }
 0x3fb   : > { %v1811_v43 = vadd.f32 %v3057_v49, %v1768_v42  ;;  %v1770_v44 = vpop.f32.mrb[49].mxu0 }
 0x3fc   : > { %1907 = vst.msk [vmem:[%s3071_s23 + $0x28] sm:$0xff] %vm3073_vm6, %v2120_v41  ;;  %v1812_v45 = vadd.f32 %v3060_v48, %v1770_v44  ;;  %v1772_v30 = vpop.f32.mrb[50].mxu0 }
 0x3fd   : > { %v1831_v4 = vmax.f32 %v1811_v43, 0.0  ;;  %v1813_v46 = vadd.f32 %v3057_v49, %v1772_v30  ;;  %v1774_v47 = vpop.f32.mrb[51].mxu0 }
 0x3fe   : > { %v1832_v50 = vmax.f32 %v1812_v45, 0.0  ;;  %v1814_v35 = vadd.f32 %v3060_v48, %v1774_v47 }
 0x3ff   : > { %v1833_v51 = vmax.f32 %v1813_v46, 0.0 }
 0x400   : > { %v2121_v52 = vpack.c.bf16 %v1832_v50, %v1831_v4  ;;  %v1834_v53 = vmax.f32 %v1814_v35, 0.0 }
 0x402   : > { %1908 = vst.msk [vmem:[%s3071_s23 + $0x30] sm:$0xff] %vm3073_vm6, %v2121_v52  ;;  %v2122_v54 = vpack.c.bf16 %v1834_v53, %v1833_v51  ;;  %v1778_v55 = vpop.f32.mrb[52].mxu0 }
 0x403   : > { %v1815_v56 = vadd.f32 %v3057_v49, %v1778_v55  ;;  %v1780_v57 = vpop.f32.mrb[53].mxu0 }
 0x404   : > { %1909 = vst.msk [vmem:[%s3071_s23 + $0x38] sm:$0xff] %vm3073_vm6, %v2122_v54  ;;  %v1816_v58 = vadd.f32 %v3060_v48, %v1780_v57  ;;  %v1782_v34 = vpop.f32.mrb[54].mxu0 }
 0x405   : > { %v1835_v5 = vmax.f32 %v1815_v56, 0.0  ;;  %v1817_v6 = vadd.f32 %v3057_v49, %v1782_v34  ;;  %v1784_v19 = vpop.f32.mrb[55].mxu0 }
 0x406   : > { %v1836_v18 = vmax.f32 %v1816_v58, 0.0  ;;  %v1818_v33 = vadd.f32 %v3060_v48, %v1784_v19 }
 0x407   : > { %v1837_v38 = vmax.f32 %v1817_v6, 0.0 }
 0x408   : > { %v2123_v59 = vpack.c.bf16 %v1836_v18, %v1835_v5  ;;  %v1838_v60 = vmax.f32 %v1818_v33, 0.0 }
 0x40a   : > { %1910 = vst.msk [vmem:[%s3071_s23 + $0x40] sm:$0xff] %vm3073_vm6, %v2123_v59  ;;  %v2124_v61 = vpack.c.bf16 %v1838_v60, %v1837_v38 }
 0x40c   : > { %1911 = vst.msk [vmem:[%s3071_s23 + $0x48] sm:$0xff] %vm3073_vm6, %v2124_v61 }
 0x40d PF: > { %s20_s13 = sadd.s32 1, %s2437_s13  }
 0x40e   : > { %p17_p4 = scmp.ge.s32.totalorder %s20_s13, 6  }
 0x410   :  { %19 = sbr.rel (!%p17_p4) target bundleno = 1 (0x1), region = 90 }

</bundles_post_ra>
